<compile_context>
chip_gen: v5e
topology: v5e:2x2
jax: 0.10.0
libtpu: 0.0.40
codegen_flags: <defaults>
</compile_context>

<pallas_src>
import math
from functools import partial

import jax
import jax.numpy as jnp
from jax.experimental import pallas as pl
from jax.experimental.pallas import tpu as pltpu

D_IN, D1, D2, D3, D4 = 768, 512, 314, 128, 64
D2_PAD = 384   # pad 314 -> 384 (multiple of 128 lanes)
D4_PAD = 128   # pad final output 64 -> 128 lanes for unmasked (lane-dense) stores


def mlp_kernel(x_ref, w1_ref, b1_ref, w2_ref, b2_ref, w3_ref, b3_ref,
               w4_ref, b4_ref, o_ref):
    h = jnp.dot(x_ref[...], w1_ref[...], preferred_element_type=jnp.float32) + b1_ref[...]
    h = jnp.maximum(h, 0.0)                                        # ReLU
    h = jnp.dot(h, w2_ref[...], preferred_element_type=jnp.float32) + b2_ref[...]
    h = jnp.maximum(h, 0.0)                                        # ReLU
    h = jnp.dot(h, w3_ref[...], preferred_element_type=jnp.float32) + b3_ref[...]
    h = jnp.maximum(h, 0.0)                                        # ReLU
    h = jnp.dot(h, w4_ref[...], preferred_element_type=jnp.float32) + b4_ref[...]
    o_ref[...] = jax.nn.sigmoid(h)                                 # Sigmoid


def _round_up(x, m):
    return ((x + m - 1) // m) * m


def _choose_tb(B, tb_max=256):
    """Batch tile: big M for the MXU, multiple of 8 sublanes, and keep >= 2 grid
    steps when the batch allows it (v7x has two TensorCores)."""
    if B <= 8:
        return 8
    half = _round_up((B + 1) // 2, 8)
    return min(tb_max, half)


def _const_spec(shape):
    """Full-array spec with a constant index_map; single-buffered (no point
    double-buffering a block that never changes)."""
    idx = lambda i: (0, 0)
    try:
        return pl.BlockSpec(shape, idx, pipeline_mode=pl.Buffered(1))
    except Exception:  # older JAX without pipeline_mode support
        return pl.BlockSpec(shape, idx)


def prepare_params(params):
    """One-time prep: pad 314 -> 384 (layers 2/3) and 64 -> 128 (layer 4) so every
    lane dimension is a multiple of 128.  Mathematically exact (see header)."""
    (w1, b1), (w2, b2), (w3, b3), (w4, b4) = params
    w2p = jnp.zeros((D1, D2_PAD), w2.dtype).at[:, :D2].set(w2)
    b2p = jnp.zeros((1, D2_PAD), b2.dtype).at[:, :D2].set(b2)
    w3p = jnp.zeros((D2_PAD, D3), w3.dtype).at[:D2, :].set(w3)
    w4p = jnp.zeros((D3, D4_PAD), w4.dtype).at[:, :D4].set(w4)
    b4p = jnp.zeros((1, D4_PAD), b4.dtype).at[:, :D4].set(b4)
    return (w1, b1, w2p, b2p, w3p, b3, w4p, b4p)


@partial(jax.jit, static_argnames=("tb",))
def mlp_forward(x, prepared_params, *, tb=None):
    w1, b1, w2p, b2p, w3p, b3, w4p, b4p = prepared_params
    B = x.shape[0]
    if tb is None:
        tb = _choose_tb(B)

    # Pad the batch up to a multiple of the tile; padded rows are independent
    # zeros and get sliced off below.
    B_pad = _round_up(B, tb)
    if B_pad != B:
        x = jnp.pad(x, ((0, B_pad - B), (0, 0)))

    out = pl.pallas_call(
        mlp_kernel,
        out_shape=jax.ShapeDtypeStruct((B_pad, D4_PAD), jnp.float32),
        grid_spec=pltpu.PrefetchScalarGridSpec(
            num_scalar_prefetch=0,
            grid=(B_pad // tb,),
            in_specs=[
                pl.BlockSpec((tb, D_IN), lambda i: (i, 0)),           # x tile over batch
                _const_spec((D_IN, D1)), _const_spec((1, D1)),        # layer 1
                _const_spec((D1, D2_PAD)), _const_spec((1, D2_PAD)),  # layer 2 (padded cols)
                _const_spec((D2_PAD, D3)), _const_spec((1, D3)),      # layer 3 (padded rows)
                _const_spec((D3, D4_PAD)), _const_spec((1, D4_PAD)),  # layer 4 (padded cols)
            ],
            out_specs=pl.BlockSpec((tb, D4_PAD), lambda i: (i, 0)),
        ),
        compiler_params=pltpu.CompilerParams(
            dimension_semantics=("parallel",)),
    )(x, w1, b1, w2p, b2p, w3p, b3, w4p, b4p)

    return out[:B, :D4]


def init_linear(key, fan_in, fan_out):
    # Matches torch.nn.Linear default init: U(-1/sqrt(fan_in), 1/sqrt(fan_in)).
    kw, kb = jax.random.split(key)
    bound = 1.0 / math.sqrt(fan_in)
    w = jax.random.uniform(kw, (fan_in, fan_out), jnp.float32, -bound, bound)
    b = jax.random.uniform(kb, (1, fan_out), jnp.float32, -bound, bound)
    return w, b


def reference_forward(x, params):
    (w1, b1), (w2, b2), (w3, b3), (w4, b4) = params
    h = jnp.maximum(x @ w1 + b1, 0.0)
    h = jnp.maximum(h @ w2 + b2, 0.0)
    h = jnp.maximum(h @ w3 + b3, 0.0)
    return jax.nn.sigmoid(h @ w4 + b4)


if __name__ == "__main__":
    key = jax.random.PRNGKey(0)
    kx, k1, k2, k3, k4 = jax.random.split(key, 5)

    # Small batch of 12: exercises the multi-step grid (2 tiles of 8), the
    # batch-tail padding path, and the lane-dense 64->128 output pad/slice.
    B = 12
    x = jax.random.normal(kx, (B, D_IN), jnp.float32)

    params = (
        init_linear(k1, D_IN, D1),
        init_linear(k2, D1, D2),
        init_linear(k3, D2, D3),
        init_linear(k4, D3, D4),
    )
    prepared = prepare_params(params)   # one-time padded-parameter prep

    out = jax.block_until_ready(mlp_forward(x, prepared))

    ref = reference_forward(x, params)
    assert out.shape == (B, D4)
    assert jnp.allclose(out, ref, atol=1e-4, rtol=1e-4), "mismatch vs reference"

    print("KERNEL_OK")
</pallas_src>

<mosaic_0001>
module attributes {stable_mosaic.version = 11 : i64} {
  func.func @mlp_kernel(%arg0: i32, %arg1: memref<8x768xf32, #tpu.memory_space<vmem>>, %arg2: memref<768x512xf32, #tpu.memory_space<vmem>>, %arg3: memref<1x512xf32, #tpu.memory_space<vmem>>, %arg4: memref<512x384xf32, #tpu.memory_space<vmem>>, %arg5: memref<1x384xf32, #tpu.memory_space<vmem>>, %arg6: memref<384x128xf32, #tpu.memory_space<vmem>>, %arg7: memref<1x128xf32, #tpu.memory_space<vmem>>, %arg8: memref<128x128xf32, #tpu.memory_space<vmem>>, %arg9: memref<1x128xf32, #tpu.memory_space<vmem>>, %arg10: memref<8x128xf32, #tpu.memory_space<vmem>>) attributes {dimension_semantics = [#tpu.dimension_semantics<parallel>], iteration_bounds = array<i64: 2>, scalar_prefetch = 0 : i64, scratch_operands = 0 : i64, tpu.core_type = #tpu.core_type<tc>, window_params = [{transform_indices = @transform_0, window_bounds = array<i64: 8, 768>}, {pipeline_mode = #tpu.pipeline_mode<synchronous>, transform_indices = @transform_1, window_bounds = array<i64: 768, 512>}, {pipeline_mode = #tpu.pipeline_mode<synchronous>, transform_indices = @transform_2, window_bounds = array<i64: 1, 512>}, {pipeline_mode = #tpu.pipeline_mode<synchronous>, transform_indices = @transform_3, window_bounds = array<i64: 512, 384>}, {pipeline_mode = #tpu.pipeline_mode<synchronous>, transform_indices = @transform_4, window_bounds = array<i64: 1, 384>}, {pipeline_mode = #tpu.pipeline_mode<synchronous>, transform_indices = @transform_5, window_bounds = array<i64: 384, 128>}, {pipeline_mode = #tpu.pipeline_mode<synchronous>, transform_indices = @transform_6, window_bounds = array<i64: 1, 128>}, {pipeline_mode = #tpu.pipeline_mode<synchronous>, transform_indices = @transform_7, window_bounds = array<i64: 128, 128>}, {pipeline_mode = #tpu.pipeline_mode<synchronous>, transform_indices = @transform_8, window_bounds = array<i64: 1, 128>}, {transform_indices = @transform_9, window_bounds = array<i64: 8, 128>}]} {
    %c0 = arith.constant 0 : index
    %c0_0 = arith.constant 0 : index
    %0 = vector.load %arg1[%c0, %c0_0] : memref<8x768xf32, #tpu.memory_space<vmem>>, vector<8x768xf32>
    %c0_1 = arith.constant 0 : index
    %c0_2 = arith.constant 0 : index
    %1 = vector.load %arg2[%c0_1, %c0_2] : memref<768x512xf32, #tpu.memory_space<vmem>>, vector<768x512xf32>
    %cst = arith.constant dense<0.000000e+00> : vector<8x512xf32>
    %2 = tpu.matmul %0, %1, %cst {dimension_numbers = #tpu.dot_dimension_numbers<[1], [0], [0], [1], [0, 0, 1, 1], [], []>} : vector<8x768xf32>, vector<768x512xf32>, vector<8x512xf32> -> vector<8x512xf32>
    %c0_3 = arith.constant 0 : index
    %c0_4 = arith.constant 0 : index
    %3 = vector.load %arg3[%c0_3, %c0_4] : memref<1x512xf32, #tpu.memory_space<vmem>>, vector<1x512xf32>
    %4 = vector.broadcast %3 : vector<1x512xf32> to vector<8x512xf32>
    %5 = arith.addf %2, %4 : vector<8x512xf32>
    %cst_5 = arith.constant 0.000000e+00 : f32
    %6 = vector.broadcast %cst_5 : f32 to vector<8x512xf32>
    %7 = arith.maximumf %5, %6 : vector<8x512xf32>
    %c0_6 = arith.constant 0 : index
    %c0_7 = arith.constant 0 : index
    %8 = vector.load %arg4[%c0_6, %c0_7] : memref<512x384xf32, #tpu.memory_space<vmem>>, vector<512x384xf32>
    %cst_8 = arith.constant dense<0.000000e+00> : vector<8x384xf32>
    %9 = tpu.matmul %7, %8, %cst_8 {dimension_numbers = #tpu.dot_dimension_numbers<[1], [0], [0], [1], [0, 0, 1, 1], [], []>} : vector<8x512xf32>, vector<512x384xf32>, vector<8x384xf32> -> vector<8x384xf32>
    %c0_9 = arith.constant 0 : index
    %c0_10 = arith.constant 0 : index
    %10 = vector.load %arg5[%c0_9, %c0_10] : memref<1x384xf32, #tpu.memory_space<vmem>>, vector<1x384xf32>
    %11 = vector.broadcast %10 : vector<1x384xf32> to vector<8x384xf32>
    %12 = arith.addf %9, %11 : vector<8x384xf32>
    %cst_11 = arith.constant 0.000000e+00 : f32
    %13 = vector.broadcast %cst_11 : f32 to vector<8x384xf32>
    %14 = arith.maximumf %12, %13 : vector<8x384xf32>
    %c0_12 = arith.constant 0 : index
    %c0_13 = arith.constant 0 : index
    %15 = vector.load %arg6[%c0_12, %c0_13] : memref<384x128xf32, #tpu.memory_space<vmem>>, vector<384x128xf32>
    %cst_14 = arith.constant dense<0.000000e+00> : vector<8x128xf32>
    %16 = tpu.matmul %14, %15, %cst_14 {dimension_numbers = #tpu.dot_dimension_numbers<[1], [0], [0], [1], [0, 0, 1, 1], [], []>} : vector<8x384xf32>, vector<384x128xf32>, vector<8x128xf32> -> vector<8x128xf32>
    %c0_15 = arith.constant 0 : index
    %c0_16 = arith.constant 0 : index
    %17 = vector.load %arg7[%c0_15, %c0_16] : memref<1x128xf32, #tpu.memory_space<vmem>>, vector<1x128xf32>
    %18 = vector.broadcast %17 : vector<1x128xf32> to vector<8x128xf32>
    %19 = arith.addf %16, %18 : vector<8x128xf32>
    %cst_17 = arith.constant 0.000000e+00 : f32
    %20 = vector.broadcast %cst_17 : f32 to vector<8x128xf32>
    %21 = arith.maximumf %19, %20 : vector<8x128xf32>
    %c0_18 = arith.constant 0 : index
    %c0_19 = arith.constant 0 : index
    %22 = vector.load %arg8[%c0_18, %c0_19] : memref<128x128xf32, #tpu.memory_space<vmem>>, vector<128x128xf32>
    %cst_20 = arith.constant dense<0.000000e+00> : vector<8x128xf32>
    %23 = tpu.matmul %21, %22, %cst_20 {dimension_numbers = #tpu.dot_dimension_numbers<[1], [0], [0], [1], [0, 0, 1, 1], [], []>} : vector<8x128xf32>, vector<128x128xf32>, vector<8x128xf32> -> vector<8x128xf32>
    %c0_21 = arith.constant 0 : index
    %c0_22 = arith.constant 0 : index
    %24 = vector.load %arg9[%c0_21, %c0_22] : memref<1x128xf32, #tpu.memory_space<vmem>>, vector<1x128xf32>
    %25 = vector.broadcast %24 : vector<1x128xf32> to vector<8x128xf32>
    %26 = arith.addf %23, %25 : vector<8x128xf32>
    %27 = arith.negf %26 : vector<8x128xf32>
    %28 = math.exp %27 : vector<8x128xf32>
    %cst_23 = arith.constant 1.000000e+00 : f32
    %29 = vector.broadcast %cst_23 : f32 to vector<8x128xf32>
    %30 = arith.addf %29, %28 : vector<8x128xf32>
    %31 = arith.divf %29, %30 : vector<8x128xf32>
    %c0_24 = arith.constant 0 : index
    %c0_25 = arith.constant 0 : index
    %32 = vector.load %arg10[%c0_24, %c0_25] : memref<8x128xf32, #tpu.memory_space<vmem>>, vector<8x128xf32>
    tpu.vector_store %arg10[%c0_24, %c0_25], %31 {strides = array<i32>} : memref<8x128xf32, #tpu.memory_space<vmem>>, vector<8x128xf32>,
    return
  }
  func.func @transform_0(%arg0: i32) -> (i32, i32) {
    %c0_i32 = arith.constant 0 : i32
    %c0_i32_0 = arith.constant 0 : i32
    return %arg0, %c0_i32 : i32, i32
  }
  func.func @transform_1(%arg0: i32) -> (i32, i32) {
    %c0_i32 = arith.constant 0 : i32
    %c0_i32_0 = arith.constant 0 : i32
    %c0_i32_1 = arith.constant 0 : i32
    return %c0_i32, %c0_i32_0 : i32, i32
  }
  func.func @transform_2(%arg0: i32) -> (i32, i32) {
    %c0_i32 = arith.constant 0 : i32
    %c0_i32_0 = arith.constant 0 : i32
    %c0_i32_1 = arith.constant 0 : i32
    return %c0_i32, %c0_i32_0 : i32, i32
  }
  func.func @transform_3(%arg0: i32) -> (i32, i32) {
    %c0_i32 = arith.constant 0 : i32
    %c0_i32_0 = arith.constant 0 : i32
    %c0_i32_1 = arith.constant 0 : i32
    return %c0_i32, %c0_i32_0 : i32, i32
  }
  func.func @transform_4(%arg0: i32) -> (i32, i32) {
    %c0_i32 = arith.constant 0 : i32
    %c0_i32_0 = arith.constant 0 : i32
    %c0_i32_1 = arith.constant 0 : i32
    return %c0_i32, %c0_i32_0 : i32, i32
  }
  func.func @transform_5(%arg0: i32) -> (i32, i32) {
    %c0_i32 = arith.constant 0 : i32
    %c0_i32_0 = arith.constant 0 : i32
    %c0_i32_1 = arith.constant 0 : i32
    return %c0_i32, %c0_i32_0 : i32, i32
  }
  func.func @transform_6(%arg0: i32) -> (i32, i32) {
    %c0_i32 = arith.constant 0 : i32
    %c0_i32_0 = arith.constant 0 : i32
    %c0_i32_1 = arith.constant 0 : i32
    return %c0_i32, %c0_i32_0 : i32, i32
  }
  func.func @transform_7(%arg0: i32) -> (i32, i32) {
    %c0_i32 = arith.constant 0 : i32
    %c0_i32_0 = arith.constant 0 : i32
    %c0_i32_1 = arith.constant 0 : i32
    return %c0_i32, %c0_i32_0 : i32, i32
  }
  func.func @transform_8(%arg0: i32) -> (i32, i32) {
    %c0_i32 = arith.constant 0 : i32
    %c0_i32_0 = arith.constant 0 : i32
    %c0_i32_1 = arith.constant 0 : i32
    return %c0_i32, %c0_i32_0 : i32, i32
  }
  func.func @transform_9(%arg0: i32) -> (i32, i32) {
    %c0_i32 = arith.constant 0 : i32
    %c0_i32_0 = arith.constant 0 : i32
    return %arg0, %c0_i32 : i32, i32
  }
}

</mosaic_0001>

<bundles_post_ra>
// kernel: mlp_forward.1
= control target key start
LH: loop header
LB: loop body
LE: loop exit
PB: predicated region body
PF: predicated region fallthrough
CT: control target
= control target key end

     0   :  { %s2887_s0 = inlined_call_operand.vmem [shape: f32[16,768], index: 0, kind: input, shape index: {}]   ;;  %s2888_s1 = inlined_call_operand.hbm [shape: f32[768,512], index: 1, kind: input, shape index: {}]   ;;  %s2889_s2 = inlined_call_operand.hbm [shape: f32[1,512], index: 2, kind: input, shape index: {}]   ;;  %s2890_s3 = inlined_call_operand.hbm [shape: f32[512,384], index: 3, kind: input, shape index: {}]   ;;  %s2891_s4 = inlined_call_operand.hbm [shape: f32[1,384], index: 4, kind: input, shape index: {}]   ;;  %s2892_s5 = inlined_call_operand.hbm [shape: f32[384,128], index: 5, kind: input, shape index: {}]   ;;  %s2893_s6 = inlined_call_operand.hbm [shape: f32[1,128], index: 6, kind: input, shape index: {}]   ;;  %s2894_s7 = inlined_call_operand.hbm [shape: f32[128,128], index: 7, kind: input, shape index: {}]   ;;  %s2895_s8 = inlined_call_operand.hbm [shape: f32[1,128], index: 8, kind: input, shape index: {}]   ;;  %s2896_s9 = inlined_call_operand.hbm [shape: f32[16,128], index: 9, kind: output, shape index: {}]  }
   0x1   :  { %2897 = sst [smem:[#allocation24_spill]] %s2888_s1 }
   0x2   :  { %2898 = sst [smem:[#allocation25_spill]] %s2889_s2 }
   0x3   :  { %2899 = sst [smem:[#allocation26_spill]] %s2890_s3 }
   0x4   :  { %2900 = sst [smem:[#allocation27_spill]] %s2891_s4 }
   0x5   :  { %2901 = sst [smem:[#allocation28_spill]] %s2892_s5 }
   0x6   :  { %14 = vsyncpa [#allocation3], 0 }
   0x7   :  { %15 = vsyncpa [#allocation6], 0 }
   0x8   :  { %16 = vsyncpa [#allocation9], 0 }
   0x9   :  { %17 = vsyncpa [#allocation12], 0 }
   0xa   :  { %18 = vsyncpa [#allocation15], 0 }
   0xb   :  { %19 = vsyncpa [#allocation4], 0 }
   0xc   :  { %21 = vsyncpa [#allocation4 + $0x1], 0  ;;  %s2662_s30 = smov 0   ;;  %s2664_s10 = smov 0  }
   0xd   :  { %s2666_s11 = smov 0   ;;  %s2668_s12 = smov 0  }
   0xe LB: > { %s2683_s13 = sadd.s32 4294967295, %s2596_s12   ;;  %s2110_s14 = sadd.s32 4294967294, %s2596_s12   ;;  %s2596_s12 = sphi %s2668_s12, %s2916_s12   ;;  %s2592_s11 = sphi %s2666_s11, %s2915_s11   ;;  %s2588_s10 = sphi %s2664_s10, %s2914_s10   ;;  %s2584_s30 = sphi %s2662_s30, %s2913_s30  }
   0xf   : > { %s2687_s15 = sadd.s32 1, %s2596_s12   ;;  %s228_s16 = sadd.s32 1, %s2592_s11 }
  0x10   : > { %s225_s17 = ssub.s32 %s2596_s12, %s2687_s15  ;;  %p238_p0 = scmp.ne.s32.totalorder %s2592_s11, %s2588_s10 }
  0x11   : > { %p226_p1 = scmp.eq.s32.totalorder %s225_s17, 0  ;;  %p239_p2 = scmp.eq.s32.totalorder %s2683_s13, 1 }
  0x12   : > { %p244_p3 = scmp.ne.s32.totalorder %s2588_s10, %s2584_s30  ;;  %p245_p4 = scmp.eq.s32.totalorder %s2110_s14, 1 }
  0x13   : > { %s2698_s18 = scalar_select %p226_p1, %s2592_s11, %s228_s16  }
  0x14   : > { %p2700_p5 = por %p239_p2, %p238_p0  ;;  %p2704_p6 = por %p245_p4, %p244_p3 }
  0x15   : > { %2902 = sst [smem:[#allocation23_spill]] %s2698_s18  ;;  %p2111_p7 = scmp.ge.s32.totalorder %s2596_s12, 1 }
  0x16   : > { %p252_p8 = scmp.lt.s32.totalorder %s2596_s12, 3  ;;  %p2201_p9 = scmp.eq.s32.totalorder %s2683_s13, 0 }
  0x17   : > { %s2906_s2 = sld [smem:[#allocation25_spill]]  ;;  %s2598_s25 = smov [#allocation5]  }
  0x18   : > { %p2711_p10 = pnand %p2111_p7, %p252_p8  ;;  %s280_s26 = sshll.u32 %s2598_s25, 4  ;;  %s281_s26 = int_to_ptr.vmem [resolvable:$true] %s280_s26 }
  0x19   : > { %s2907_s4 = sld [smem:[#allocation27_spill]]  ;;  %s330_s22 = sshll.u32 %s2893_s6, 4  ;;  %s331_s22 = int_to_ptr.hbm [resolvable:$true] %s330_s22 }
  0x1a   : > { %p2172_p11 = pneg %p2711_p10  ;;  %s2599_s23 = smov [#allocation8]  }
  0x1b   : > { %s306_s25 = sshll.u32 %s2599_s23, 4  ;;  %s2909_s1 = sld [smem:[#allocation24_spill]]  ;;  %s307_s25 = int_to_ptr.vmem [resolvable:$true] %s306_s25 }
  0x1c   : > { %p2725_p12 = pnand %p2201_p9, %p2172_p11  ;;  %s2601_s16 = smov [#allocation2]  }
  0x1d   : > { %s278_s24 = sshll.u32 %s2906_s2, 4  ;;  %s265_s17 = sshll.u32 %s2601_s16, 4  ;;  %s279_s24 = int_to_ptr.hbm [resolvable:$true] %s278_s24  ;;  %s266_s17 = int_to_ptr.vmem [resolvable:$true] %s265_s17 }
  0x1e   : > { %2178 = dma.hbm_to_vmem [thread:$0]  (!%p2725_p12), %s279_s24, 64, %s281_s26, [#allocation6]  }
  0x1f   : > { %s304_s29 = sshll.u32 %s2907_s4, 4  ;;  %s2600_s4 = smov [#allocation11]   ;;  %s305_s29 = int_to_ptr.hbm [resolvable:$true] %s304_s29 }
  0x20   : > { %2184 = dma.hbm_to_vmem [thread:$0]  (!%p2725_p12), %s305_s29, 48, %s307_s25, [#allocation9]  }
  0x21   : > { %s263_s2 = sshll.u32 %s2909_s1, 4  ;;  %s332_s18 = sshll.u32 %s2600_s4, 4  ;;  %s264_s2 = int_to_ptr.hbm [resolvable:$true] %s263_s2  ;;  %s333_s18 = int_to_ptr.vmem [resolvable:$true] %s332_s18 }
  0x22   : > { %2190 = dma.hbm_to_vmem [thread:$0]  (!%p2725_p12), %s331_s22, 16, %s333_s18, [#allocation12]  }
  0x23   : > { %s2602_s23 = smov 512   ;;  %s2603_s24 = smov 32  }
  0x24   : > { %2175 = dma.hbm_to_vmem [thread:$0]  (!%p2725_p12), %s264_s2, 49152, %s266_s17, [#allocation3], %s2602_s23, %s2602_s23, %s2603_s24  }
  0x25   : > { %s2910_s3 = sld [smem:[#allocation26_spill]]  ;;  %s2604_s27 = smov [#allocation7]  }
  0x26   : > { %s291_s4 = sshll.u32 %s2604_s27, 4  ;;  %s2911_s5 = sld [smem:[#allocation28_spill]]  ;;  %s292_s4 = int_to_ptr.vmem [resolvable:$true] %s291_s4 }
  0x27   : > { %s2605_s22 = smov 384   ;;  %s2606_s16 = smov 24  }
  0x28   : > { %s2607_s2 = smov [#allocation10]   ;;  %s2608_s23 = smov 128  }
  0x29   : > { %s317_s17 = sshll.u32 %s2607_s2, 4  ;;  %s2609_s24 = smov 8   ;;  %s318_s17 = int_to_ptr.vmem [resolvable:$true] %s317_s17 }
  0x2a   : > { %s341_s27 = sshll.u32 %s2894_s7, 4  ;;  %s2610_s1 = smov [#allocation13]   ;;  %s342_s27 = int_to_ptr.hbm [resolvable:$true] %s341_s27 }
  0x2b   : > { %s289_s25 = sshll.u32 %s2910_s3, 4  ;;  %s343_s28 = sshll.u32 %s2610_s1, 4  ;;  %s290_s25 = int_to_ptr.hbm [resolvable:$true] %s289_s25  ;;  %s344_s28 = int_to_ptr.vmem [resolvable:$true] %s343_s28 }
  0x2c   : > { %s315_s18 = sshll.u32 %s2911_s5, 4  ;;  %s316_s18 = int_to_ptr.hbm [resolvable:$true] %s315_s18 }
  0x2d   : > { %2181 = dma.hbm_to_vmem [thread:$0]  (!%p2725_p12), %s290_s25, 24576, %s292_s4, [#allocation6], %s2605_s22, %s2605_s22, %s2606_s16  }
  0x2e   : > { %2187 = dma.hbm_to_vmem [thread:$0]  (!%p2725_p12), %s316_s18, 6144, %s318_s17, [#allocation9], %s2608_s23, %s2608_s23, %s2609_s24  }
  0x2f   : > { %s356_s25 = sshll.u32 %s2895_s8, 4  ;;  %s2611_s4 = smov [#allocation14]   ;;  %s357_s25 = int_to_ptr.hbm [resolvable:$true] %s356_s25 }
  0x30   : > { %2193 = dma.hbm_to_vmem [thread:$0]  (!%p2725_p12), %s342_s27, 2048, %s344_s28, [#allocation12], %s2608_s23, %s2608_s23, %s2609_s24  }
  0x31   : > { %s358_s22 = sshll.u32 %s2611_s4, 4  ;;  %379 = sbr.rel (%p2711_p10) target bundleno = 905 (0x389), region = 56  ;;  %s359_s22 = int_to_ptr.vmem [resolvable:$true] %s358_s22 }
  0x32   : > { %2196 = dma.hbm_to_vmem [thread:$0]  (!%p2725_p12), %s357_s25, 16, %s359_s22, [#allocation15]  }
  0x36   : > { %2559 = dma.done.wait (%p2201_p9), [#allocation3], 49152  }
  0x37   : > { %2561 = vsyncadd (%p2201_p9), [#allocation3], 4294918144 }
  0x38   : > { %2563 = dma.done.wait (%p2201_p9), [#allocation6], 24640  }
  0x39   : > { %2565 = vsyncadd (%p2201_p9), [#allocation6], 4294942656 }
  0x3a   : > { %2567 = dma.done.wait (%p2201_p9), [#allocation9], 6192  }
  0x3b   : > { %2569 = vsyncadd (%p2201_p9), [#allocation9], 4294961104 }
  0x3c   : > { %2571 = dma.done.wait (%p2201_p9), [#allocation12], 2064  }
  0x3d   : > { %2573 = vsyncadd (%p2201_p9), [#allocation12], 4294965232 }
  0x3e   : > { %2575 = dma.done.wait (%p2201_p9), [#allocation15], 16  }
  0x3f   : > { %2577 = vsyncadd (%p2201_p9), [#allocation15], 4294967280  ;;  %v522_v0 = vld [vmem:[#allocation2 + $0x1e0] sm:$0xff]  ;;  %p451_p13 = scmp.lt.s32.totalorder %s2683_s13, 1  ;;  %s448_s16 = sand.u32 1, %s2588_s10  }
  0x40   : > { %v586_v1 = vld [vmem:[#allocation2 + $0x3e0] sm:$0xff]  ;;  %856 = vmatpush.msra.mxu0 %v522_v0  ;;  %s2130_s2 = sshll.u32 %s448_s16, 3  ;;  %s2134_s17 = sshll.u32 %s2683_s13, 3 }
  0x41   : > { %v650_v2 = vld [vmem:[#allocation2 + $0x5e0] sm:$0xff]  ;;  %876 = vmatpush.msra.mxu1 %v586_v1  ;;  %v523_v1 = vld [vmem:[#allocation2 + $0x1e8] sm:$0xff]  ;;  %s2789_s3 = scalar_select %p451_p13, %s2683_s13, 1 }
  0x42   : > { %v518_v3 = vld [vmem:[#allocation2 + $0x1c0] sm:$0xff]  ;;  %896 = vmatpush.msra.mxu2 %v650_v2  ;;  %s1967_s26 = scalar_lea.hbm %s2896_s9, %s2134_s17  ;;  %s450_s29 = scalar_lea.vmem [#allocation16], %s2130_s2 }
  0x43   : > { %v582_v4 = vld [vmem:[#allocation2 + $0x3c0] sm:$0xff]  ;;  %857 = vmatpush.msra.mxu0 %v518_v3  ;;  %s2137_s5 = smul.u32 48, %s2789_s3  ;;  %s1969_s27 = sshll.u32 %s450_s29, 4  ;;  %s1970_s27 = int_to_ptr.vmem [resolvable:$true] %s1969_s27 }
  0x44   : > { %v646_v5 = vld [vmem:[#allocation2 + $0x5c0] sm:$0xff]  ;;  %877 = vmatpush.msra.mxu1 %v582_v4  ;;  %s1971_s1 = sshll.u32 %s1967_s26, 4  ;;  %s1957_s13 = scalar_lea.sflag [#allocation4], %s448_s16  ;;  %s1972_s1 = int_to_ptr.hbm [resolvable:$true] %s1971_s1 }
  0x45   : > { %v714_v6 = vld [vmem:[#allocation2 + $0x7e0] sm:$0xff]  ;;  %897 = vmatpush.msra.mxu2 %v646_v5  ;;  %v519_v5 = vld [vmem:[#allocation2 + $0x1c8] sm:$0xff]  ;;  %s2795_s18 = scalar_lea.vmem %s2887_s0, %s2137_s5  ;;  %s2528_s28 = sshra.s32 %s1972_s1, 4  ;;  %s2529_s28 = int_to_ptr.hbm [resolvable:$true] %s2528_s28 }
  0x46   : > { %v514_v7 = vld [vmem:[#allocation2 + $0x1a0] sm:$0xff]  ;;  %916 = vmatpush.msra.mxu3 %v714_v6  ;;  %v587_v6 = vld [vmem:[#allocation2 + $0x3e8] sm:$0xff]  ;;  %s2530_s25 = scalar_lea.hbm %s2529_s28, 8  ;;  %s2534_s3 = scalar_lea.hbm %s2896_s9, 16 }
  0x47   : > { %v578_v8 = vld [vmem:[#allocation2 + $0x3a0] sm:$0xff]  ;;  %858 = vmatpush.msra.mxu0 %v514_v7  ;;  %p2531_p0 = scmp.ne.s32.totalorder %s2529_s28, %s2530_s25  ;;  %p2535_p3 = scmp.lt.s32.totalorder %s2529_s28, %s2896_s9 }
  0x48   : > { %v642_v9 = vld [vmem:[#allocation2 + $0x5a0] sm:$0xff]  ;;  %878 = vmatpush.msra.mxu1 %v578_v8  ;;  %p2536_p4 = scmp.lt.s32.totalorder %s2534_s3, %s2530_s25 }
  0x49   : > { %v710_v10 = vld [vmem:[#allocation2 + $0x7c0] sm:$0xff]  ;;  %898 = vmatpush.msra.mxu2 %v642_v9  ;;  %v515_v9 = vld [vmem:[#allocation2 + $0x1a8] sm:$0xff]  ;;  %p2532_p1 = pnand %p2531_p0, %p2700_p5 }
  0x4a   : > { %v510_v11 = vld [vmem:[#allocation2 + $0x180] sm:$0xff]  ;;  %917 = vmatpush.msra.mxu3 %v710_v10  ;;  %v583_v10 = vld [vmem:[#allocation2 + $0x3c8] sm:$0xff]  ;;  %p2537_p7 = por %p2536_p4, %p2535_p3 }
  0x4b   : > { %v574_v12 = vld [vmem:[#allocation2 + $0x380] sm:$0xff]  ;;  %859 = vmatpush.msra.mxu0 %v510_v11  ;;  %p2533_p2 = pneg %p2532_p1 }
  0x4c   : > { %v638_v13 = vld [vmem:[#allocation2 + $0x580] sm:$0xff]  ;;  %879 = vmatpush.msra.mxu1 %v574_v12 }
  0x4d   : > { %v706_v14 = vld [vmem:[#allocation2 + $0x7a0] sm:$0xff]  ;;  %899 = vmatpush.msra.mxu2 %v638_v13  ;;  %v511_v13 = vld [vmem:[#allocation2 + $0x188] sm:$0xff]  ;;  %p2538_p8 = pnand %p2537_p7, %p2533_p2 }
  0x4e   : > { %v506_v15 = vld [vmem:[#allocation2 + $0x160] sm:$0xff]  ;;  %918 = vmatpush.msra.mxu3 %v706_v14  ;;  %v579_v14 = vld [vmem:[#allocation2 + $0x3a8] sm:$0xff] }
  0x4f   : > { %v570_v16 = vld [vmem:[#allocation2 + $0x360] sm:$0xff]  ;;  %860 = vmatpush.msra.mxu0 %v506_v15 }
  0x50   : > { %v634_v17 = vld [vmem:[#allocation2 + $0x560] sm:$0xff]  ;;  %880 = vmatpush.msra.mxu1 %v570_v16 }
  0x51   : > { %v702_v18 = vld [vmem:[#allocation2 + $0x780] sm:$0xff]  ;;  %900 = vmatpush.msra.mxu2 %v634_v17  ;;  %v507_v17 = vld [vmem:[#allocation2 + $0x168] sm:$0xff] }
  0x52   : > { %v502_v19 = vld [vmem:[#allocation2 + $0x140] sm:$0xff]  ;;  %919 = vmatpush.msra.mxu3 %v702_v18  ;;  %v575_v18 = vld [vmem:[#allocation2 + $0x388] sm:$0xff] }
  0x53   : > { %v566_v20 = vld [vmem:[#allocation2 + $0x340] sm:$0xff]  ;;  %861 = vmatpush.msra.mxu0 %v502_v19 }
  0x54   : > { %v630_v21 = vld [vmem:[#allocation2 + $0x540] sm:$0xff]  ;;  %881 = vmatpush.msra.mxu1 %v566_v20 }
  0x55   : > { %v698_v22 = vld [vmem:[#allocation2 + $0x760] sm:$0xff]  ;;  %901 = vmatpush.msra.mxu2 %v630_v21  ;;  %v503_v21 = vld [vmem:[#allocation2 + $0x148] sm:$0xff] }
  0x56   : > { %v498_v23 = vld [vmem:[#allocation2 + $0x120] sm:$0xff]  ;;  %920 = vmatpush.msra.mxu3 %v698_v22  ;;  %v571_v22 = vld [vmem:[#allocation2 + $0x368] sm:$0xff] }
  0x57   : > { %v562_v24 = vld [vmem:[#allocation2 + $0x320] sm:$0xff]  ;;  %862 = vmatpush.msra.mxu0 %v498_v23 }
  0x58   : > { %v626_v25 = vld [vmem:[#allocation2 + $0x520] sm:$0xff]  ;;  %882 = vmatpush.msra.mxu1 %v562_v24 }
  0x59   : > { %v694_v26 = vld [vmem:[#allocation2 + $0x740] sm:$0xff]  ;;  %902 = vmatpush.msra.mxu2 %v626_v25  ;;  %v499_v25 = vld [vmem:[#allocation2 + $0x128] sm:$0xff] }
  0x5a   : > { %v494_v27 = vld [vmem:[#allocation2 + $0x100] sm:$0xff]  ;;  %921 = vmatpush.msra.mxu3 %v694_v26  ;;  %v567_v26 = vld [vmem:[#allocation2 + $0x348] sm:$0xff] }
  0x5b   : > { %v558_v28 = vld [vmem:[#allocation2 + $0x300] sm:$0xff]  ;;  %863 = vmatpush.msra.mxu0 %v494_v27 }
  0x5c   : > { %v622_v29 = vld [vmem:[#allocation2 + $0x500] sm:$0xff]  ;;  %883 = vmatpush.msra.mxu1 %v558_v28 }
  0x5d   : > { %v690_v30 = vld [vmem:[#allocation2 + $0x720] sm:$0xff]  ;;  %903 = vmatpush.msra.mxu2 %v622_v29  ;;  %v495_v29 = vld [vmem:[#allocation2 + $0x108] sm:$0xff] }
  0x5e   : > { %v490_v31 = vld [vmem:[#allocation2 + $0xe0] sm:$0xff]  ;;  %922 = vmatpush.msra.mxu3 %v690_v30  ;;  %v563_v30 = vld [vmem:[#allocation2 + $0x328] sm:$0xff] }
  0x5f   : > { %v554_v32 = vld [vmem:[#allocation2 + $0x2e0] sm:$0xff]  ;;  %864 = vmatpush.msra.mxu0 %v490_v31 }
  0x60   : > { %v618_v33 = vld [vmem:[#allocation2 + $0x4e0] sm:$0xff]  ;;  %884 = vmatpush.msra.mxu1 %v554_v32 }
  0x61   : > { %v686_v34 = vld [vmem:[#allocation2 + $0x700] sm:$0xff]  ;;  %904 = vmatpush.msra.mxu2 %v618_v33  ;;  %v491_v33 = vld [vmem:[#allocation2 + $0xe8] sm:$0xff] }
  0x62   : > { %v486_v35 = vld [vmem:[#allocation2 + $0xc0] sm:$0xff]  ;;  %923 = vmatpush.msra.mxu3 %v686_v34  ;;  %v559_v34 = vld [vmem:[#allocation2 + $0x308] sm:$0xff] }
  0x63   : > { %v550_v36 = vld [vmem:[#allocation2 + $0x2c0] sm:$0xff]  ;;  %865 = vmatpush.msra.mxu0 %v486_v35 }
  0x64   : > { %v614_v37 = vld [vmem:[#allocation2 + $0x4c0] sm:$0xff]  ;;  %885 = vmatpush.msra.mxu1 %v550_v36 }
  0x65   : > { %v682_v38 = vld [vmem:[#allocation2 + $0x6e0] sm:$0xff]  ;;  %905 = vmatpush.msra.mxu2 %v614_v37  ;;  %v487_v37 = vld [vmem:[#allocation2 + $0xc8] sm:$0xff] }
  0x66   : > { %v482_v39 = vld [vmem:[#allocation2 + $0xa0] sm:$0xff]  ;;  %924 = vmatpush.msra.mxu3 %v682_v38  ;;  %v555_v38 = vld [vmem:[#allocation2 + $0x2e8] sm:$0xff] }
  0x67   : > { %v546_v40 = vld [vmem:[#allocation2 + $0x2a0] sm:$0xff]  ;;  %866 = vmatpush.msra.mxu0 %v482_v39 }
  0x68   : > { %v610_v41 = vld [vmem:[#allocation2 + $0x4a0] sm:$0xff]  ;;  %886 = vmatpush.msra.mxu1 %v546_v40 }
  0x69   : > { %v678_v42 = vld [vmem:[#allocation2 + $0x6c0] sm:$0xff]  ;;  %906 = vmatpush.msra.mxu2 %v610_v41  ;;  %v483_v41 = vld [vmem:[#allocation2 + $0xa8] sm:$0xff] }
  0x6a   : > { %v478_v43 = vld [vmem:[#allocation2 + $0x80] sm:$0xff]  ;;  %925 = vmatpush.msra.mxu3 %v678_v42  ;;  %v551_v42 = vld [vmem:[#allocation2 + $0x2c8] sm:$0xff] }
  0x6b   : > { %v542_v44 = vld [vmem:[#allocation2 + $0x280] sm:$0xff]  ;;  %867 = vmatpush.msra.mxu0 %v478_v43 }
  0x6c   : > { %v606_v45 = vld [vmem:[#allocation2 + $0x480] sm:$0xff]  ;;  %887 = vmatpush.msra.mxu1 %v542_v44 }
  0x6d   : > { %v674_v46 = vld [vmem:[#allocation2 + $0x6a0] sm:$0xff]  ;;  %907 = vmatpush.msra.mxu2 %v606_v45  ;;  %v479_v45 = vld [vmem:[#allocation2 + $0x88] sm:$0xff] }
  0x6e   : > { %v474_v47 = vld [vmem:[#allocation2 + $0x60] sm:$0xff]  ;;  %926 = vmatpush.msra.mxu3 %v674_v46  ;;  %v547_v46 = vld [vmem:[#allocation2 + $0x2a8] sm:$0xff] }
  0x6f   : > { %v538_v48 = vld [vmem:[#allocation2 + $0x260] sm:$0xff]  ;;  %868 = vmatpush.msra.mxu0 %v474_v47 }
  0x70   : > { %v602_v49 = vld [vmem:[#allocation2 + $0x460] sm:$0xff]  ;;  %888 = vmatpush.msra.mxu1 %v538_v48 }
  0x71   : > { %v670_v50 = vld [vmem:[#allocation2 + $0x680] sm:$0xff]  ;;  %908 = vmatpush.msra.mxu2 %v602_v49  ;;  %v475_v49 = vld [vmem:[#allocation2 + $0x68] sm:$0xff] }
  0x72   : > { %v470_v51 = vld [vmem:[#allocation2 + $0x40] sm:$0xff]  ;;  %927 = vmatpush.msra.mxu3 %v670_v50  ;;  %v543_v50 = vld [vmem:[#allocation2 + $0x288] sm:$0xff] }
  0x73   : > { %v534_v52 = vld [vmem:[#allocation2 + $0x240] sm:$0xff]  ;;  %869 = vmatpush.msra.mxu0 %v470_v51 }
  0x74   : > { %v598_v53 = vld [vmem:[#allocation2 + $0x440] sm:$0xff]  ;;  %889 = vmatpush.msra.mxu1 %v534_v52 }
  0x75   : > { %v666_v54 = vld [vmem:[#allocation2 + $0x660] sm:$0xff]  ;;  %909 = vmatpush.msra.mxu2 %v598_v53  ;;  %v471_v53 = vld [vmem:[#allocation2 + $0x48] sm:$0xff] }
  0x76   : > { %v466_v55 = vld [vmem:[#allocation2 + $0x20] sm:$0xff]  ;;  %928 = vmatpush.msra.mxu3 %v666_v54  ;;  %v539_v54 = vld [vmem:[#allocation2 + $0x268] sm:$0xff] }
  0x77   : > { %v530_v56 = vld [vmem:[#allocation2 + $0x220] sm:$0xff]  ;;  %870 = vmatpush.msra.mxu0 %v466_v55 }
  0x78   : > { %v594_v57 = vld [vmem:[#allocation2 + $0x420] sm:$0xff]  ;;  %890 = vmatpush.msra.mxu1 %v530_v56 }
  0x79   : > { %v662_v58 = vld [vmem:[#allocation2 + $0x640] sm:$0xff]  ;;  %910 = vmatpush.msra.mxu2 %v594_v57  ;;  %v467_v57 = vld [vmem:[#allocation2 + $0x28] sm:$0xff] }
  0x7a   : > { %v462_v59 = vld [vmem:[#allocation2] sm:$0xff]  ;;  %929 = vmatpush.msra.mxu3 %v662_v58  ;;  %v535_v58 = vld [vmem:[#allocation2 + $0x248] sm:$0xff] }
  0x7b   : > { %v526_v60 = vld [vmem:[#allocation2 + $0x200] sm:$0xff]  ;;  %871 = vmatpush.msra.mxu0 %v462_v59 }
  0x7c   : > { %v590_v61 = vld [vmem:[#allocation2 + $0x400] sm:$0xff]  ;;  %891 = vmatpush.msra.mxu1 %v526_v60 }
  0x7d   : > { %v658_v62 = vld [vmem:[#allocation2 + $0x620] sm:$0xff]  ;;  %911 = vmatpush.msra.mxu2 %v590_v61  ;;  %v463_v61 = vld [vmem:[#allocation2 + $0x8] sm:$0xff] }
  0x7e   : > { %v778_v63 = vld [vmem:[#allocation2 + $0x9e0] sm:$0xff]  ;;  %930 = vmatpush.msra.mxu3 %v658_v62  ;;  %v531_v62 = vld [vmem:[#allocation2 + $0x228] sm:$0xff] }
  0x7f   : > { %v842_v0 = vld [vmem:[#allocation2 + $0xbe0] sm:$0xff]  ;;  %936 = vmatpush.msrb.mxu0 %v778_v63  ;;  %976 = vmatpush.msrb.mxu2 %v523_v1  ;;  %v2804_v1 = vld [vmem:[%s2795_s18 + $0x10] sm:$0xff] }
  0x80   : > { %v654_v2 = vld [vmem:[#allocation2 + $0x600] sm:$0xff]  ;;  %956 = vmatpush.msrb.mxu1 %v842_v0  ;;  %v2801_v0 = vld [vmem:[%s2795_s18 + $0x8] sm:$0xff]  ;;  %912 = vmatmul.f32.vlgmr.msra.gmra.mxu2 %v2804_v1 }
  0x81   : > { %v774_v3 = vld [vmem:[#allocation2 + $0x9c0] sm:$0xff]  ;;  %931 = vmatpush.msra.mxu3 %v654_v2  ;;  %977 = vmatpush.msrb.mxu2 %v519_v5  ;;  %v651_v2 = vld [vmem:[#allocation2 + $0x5e8] sm:$0xff] }
  0x82   : > { %v838_v4 = vld [vmem:[#allocation2 + $0xbc0] sm:$0xff]  ;;  %937 = vmatpush.msrb.mxu0 %v774_v3  ;;  %v715_v3 = vld [vmem:[#allocation2 + $0x7e8] sm:$0xff]  ;;  %892 = vmatmul.f32.vlgmr.msra.gmra.mxu1 %v2801_v0 }
  0x83   : > { %v770_v7 = vld [vmem:[#allocation2 + $0x9a0] sm:$0xff]  ;;  %957 = vmatpush.msrb.mxu1 %v838_v4  ;;  %996 = vmatpush.msrb.mxu3 %v587_v6  ;;  %v779_v4 = vld [vmem:[#allocation2 + $0x9e8] sm:$0xff] }
  0x84   : > { %v834_v8 = vld [vmem:[#allocation2 + $0xba0] sm:$0xff]  ;;  %938 = vmatpush.msrb.mxu0 %v770_v7  ;;  %978 = vmatpush.msrb.mxu2 %v515_v9  ;;  %v527_v5 = vld [vmem:[#allocation2 + $0x208] sm:$0xff]  ;;  %v2810_v7 = vld [vmem:[%s2795_s18 + $0x18] sm:$0xff] }
  0x85   : > { %v766_v11 = vld [vmem:[#allocation2 + $0x980] sm:$0xff]  ;;  %958 = vmatpush.msrb.mxu1 %v834_v8  ;;  %997 = vmatpush.msrb.mxu3 %v583_v10  ;;  %v647_v6 = vld [vmem:[#allocation2 + $0x5c8] sm:$0xff] }
  0x86   : > { %v830_v12 = vld [vmem:[#allocation2 + $0xb80] sm:$0xff]  ;;  %939 = vmatpush.msrb.mxu0 %v766_v11  ;;  %979 = vmatpush.msrb.mxu2 %v511_v13  ;;  %v711_v8 = vld [vmem:[#allocation2 + $0x7c8] sm:$0xff] }
  0x87   : > { %v762_v15 = vld [vmem:[#allocation2 + $0x960] sm:$0xff]  ;;  %959 = vmatpush.msrb.mxu1 %v830_v12  ;;  %998 = vmatpush.msrb.mxu3 %v579_v14  ;;  %v775_v9 = vld [vmem:[#allocation2 + $0x9c8] sm:$0xff] }
  0x88   : > { %v826_v16 = vld [vmem:[#allocation2 + $0xb60] sm:$0xff]  ;;  %940 = vmatpush.msrb.mxu0 %v762_v15  ;;  %980 = vmatpush.msrb.mxu2 %v507_v17  ;;  %v843_v10 = vld [vmem:[#allocation2 + $0xbe8] sm:$0xff] }
  0x89   : > { %v758_v19 = vld [vmem:[#allocation2 + $0x940] sm:$0xff]  ;;  %960 = vmatpush.msrb.mxu1 %v826_v16  ;;  %999 = vmatpush.msrb.mxu3 %v575_v18  ;;  %v643_v11 = vld [vmem:[#allocation2 + $0x5a8] sm:$0xff] }
  0x8a   : > { %v822_v20 = vld [vmem:[#allocation2 + $0xb40] sm:$0xff]  ;;  %941 = vmatpush.msrb.mxu0 %v758_v19  ;;  %981 = vmatpush.msrb.mxu2 %v503_v21  ;;  %v707_v12 = vld [vmem:[#allocation2 + $0x7a8] sm:$0xff] }
  0x8b   : > { %v754_v23 = vld [vmem:[#allocation2 + $0x920] sm:$0xff]  ;;  %961 = vmatpush.msrb.mxu1 %v822_v20  ;;  %1000 = vmatpush.msrb.mxu3 %v571_v22  ;;  %v771_v13 = vld [vmem:[#allocation2 + $0x9a8] sm:$0xff] }
  0x8c   : > { %v818_v24 = vld [vmem:[#allocation2 + $0xb20] sm:$0xff]  ;;  %942 = vmatpush.msrb.mxu0 %v754_v23  ;;  %982 = vmatpush.msrb.mxu2 %v499_v25  ;;  %v839_v14 = vld [vmem:[#allocation2 + $0xbc8] sm:$0xff] }
  0x8d   : > { %v750_v27 = vld [vmem:[#allocation2 + $0x900] sm:$0xff]  ;;  %962 = vmatpush.msrb.mxu1 %v818_v24  ;;  %1001 = vmatpush.msrb.mxu3 %v567_v26  ;;  %v639_v15 = vld [vmem:[#allocation2 + $0x588] sm:$0xff] }
  0x8e   : > { %v814_v28 = vld [vmem:[#allocation2 + $0xb00] sm:$0xff]  ;;  %943 = vmatpush.msrb.mxu0 %v750_v27  ;;  %983 = vmatpush.msrb.mxu2 %v495_v29  ;;  %v703_v16 = vld [vmem:[#allocation2 + $0x788] sm:$0xff] }
  0x8f   : > { %v746_v31 = vld [vmem:[#allocation2 + $0x8e0] sm:$0xff]  ;;  %963 = vmatpush.msrb.mxu1 %v814_v28  ;;  %1002 = vmatpush.msrb.mxu3 %v563_v30  ;;  %v767_v17 = vld [vmem:[#allocation2 + $0x988] sm:$0xff] }
  0x90   : > { %v810_v32 = vld [vmem:[#allocation2 + $0xae0] sm:$0xff]  ;;  %944 = vmatpush.msrb.mxu0 %v746_v31  ;;  %984 = vmatpush.msrb.mxu2 %v491_v33  ;;  %v835_v18 = vld [vmem:[#allocation2 + $0xba8] sm:$0xff] }
  0x91   : > { %v742_v35 = vld [vmem:[#allocation2 + $0x8c0] sm:$0xff]  ;;  %964 = vmatpush.msrb.mxu1 %v810_v32  ;;  %1003 = vmatpush.msrb.mxu3 %v559_v34  ;;  %v635_v19 = vld [vmem:[#allocation2 + $0x568] sm:$0xff] }
  0x92   : > { %v806_v36 = vld [vmem:[#allocation2 + $0xac0] sm:$0xff]  ;;  %945 = vmatpush.msrb.mxu0 %v742_v35  ;;  %985 = vmatpush.msrb.mxu2 %v487_v37  ;;  %v699_v20 = vld [vmem:[#allocation2 + $0x768] sm:$0xff] }
  0x93   : > { %v738_v39 = vld [vmem:[#allocation2 + $0x8a0] sm:$0xff]  ;;  %965 = vmatpush.msrb.mxu1 %v806_v36  ;;  %1004 = vmatpush.msrb.mxu3 %v555_v38  ;;  %v763_v21 = vld [vmem:[#allocation2 + $0x968] sm:$0xff] }
  0x94   : > { %v802_v40 = vld [vmem:[#allocation2 + $0xaa0] sm:$0xff]  ;;  %946 = vmatpush.msrb.mxu0 %v738_v39  ;;  %986 = vmatpush.msrb.mxu2 %v483_v41  ;;  %v831_v22 = vld [vmem:[#allocation2 + $0xb88] sm:$0xff] }
  0x95   : > { %v734_v43 = vld [vmem:[#allocation2 + $0x880] sm:$0xff]  ;;  %966 = vmatpush.msrb.mxu1 %v802_v40  ;;  %1005 = vmatpush.msrb.mxu3 %v551_v42  ;;  %v695_v24 = vld [vmem:[#allocation2 + $0x748] sm:$0xff] }
  0x96   : > { %v798_v44 = vld [vmem:[#allocation2 + $0xa80] sm:$0xff]  ;;  %947 = vmatpush.msrb.mxu0 %v734_v43  ;;  %987 = vmatpush.msrb.mxu2 %v479_v45  ;;  %v631_v25 = vld [vmem:[#allocation2 + $0x548] sm:$0xff] }
  0x97   : > { %v730_v47 = vld [vmem:[#allocation2 + $0x860] sm:$0xff]  ;;  %967 = vmatpush.msrb.mxu1 %v798_v44  ;;  %1006 = vmatpush.msrb.mxu3 %v547_v46  ;;  %v759_v26 = vld [vmem:[#allocation2 + $0x948] sm:$0xff] }
  0x98   : > { %v794_v48 = vld [vmem:[#allocation2 + $0xa60] sm:$0xff]  ;;  %948 = vmatpush.msrb.mxu0 %v730_v47  ;;  %988 = vmatpush.msrb.mxu2 %v475_v49  ;;  %v827_v27 = vld [vmem:[#allocation2 + $0xb68] sm:$0xff] }
  0x99   : > { %v726_v51 = vld [vmem:[#allocation2 + $0x840] sm:$0xff]  ;;  %968 = vmatpush.msrb.mxu1 %v794_v48  ;;  %1007 = vmatpush.msrb.mxu3 %v543_v50  ;;  %v2817_v28 = vld [vmem:[%s2795_s18 + $0x28] sm:$0xff] }
  0x9a   : > { %v790_v52 = vld [vmem:[#allocation2 + $0xa40] sm:$0xff]  ;;  %949 = vmatpush.msrb.mxu0 %v726_v51  ;;  %989 = vmatpush.msrb.mxu2 %v471_v53  ;;  %v627_v29 = vld [vmem:[#allocation2 + $0x528] sm:$0xff] }
  0x9b   : > { %v722_v55 = vld [vmem:[#allocation2 + $0x820] sm:$0xff]  ;;  %969 = vmatpush.msrb.mxu1 %v790_v52  ;;  %1008 = vmatpush.msrb.mxu3 %v539_v54  ;;  %v691_v30 = vld [vmem:[#allocation2 + $0x728] sm:$0xff] }
  0x9c   : > { %v786_v56 = vld [vmem:[#allocation2 + $0xa20] sm:$0xff]  ;;  %950 = vmatpush.msrb.mxu0 %v722_v55  ;;  %990 = vmatpush.msrb.mxu2 %v467_v57  ;;  %v755_v31 = vld [vmem:[#allocation2 + $0x928] sm:$0xff] }
  0x9d   : > { %v718_v59 = vld [vmem:[#allocation2 + $0x800] sm:$0xff]  ;;  %970 = vmatpush.msrb.mxu1 %v786_v56  ;;  %1009 = vmatpush.msrb.mxu3 %v535_v58  ;;  %v823_v32 = vld [vmem:[#allocation2 + $0xb48] sm:$0xff] }
  0x9e   : > { %v782_v60 = vld [vmem:[#allocation2 + $0xa00] sm:$0xff]  ;;  %951 = vmatpush.msrb.mxu0 %v718_v59  ;;  %991 = vmatpush.msrb.mxu2 %v463_v61  ;;  %v623_v33 = vld [vmem:[#allocation2 + $0x508] sm:$0xff] }
  0x9f   : > { %v2798_v63 = vld [vmem:[%s2795_s18] sm:$0xff]  ;;  %971 = vmatpush.msrb.mxu1 %v782_v60  ;;  %1010 = vmatpush.msrb.mxu3 %v531_v62  ;;  %v687_v34 = vld [vmem:[#allocation2 + $0x708] sm:$0xff] }
  0xa0   : > { %872 = vmatmul.f32.vlgmr.msra.gmra.mxu0 %v2798_v63  ;;  %1056 = vmatpush.msra.mxu2 %v779_v4  ;;  %v2814_v23 = vld [vmem:[%s2795_s18 + $0x20] sm:$0xff]  ;;  %v751_v35 = vld [vmem:[#allocation2 + $0x908] sm:$0xff] }
  0xa1   : > { %1016 = vmatpush.msra.mxu0 %v651_v2  ;;  %1036 = vmatpush.msra.mxu1 %v715_v3  ;;  %v819_v36 = vld [vmem:[#allocation2 + $0xb28] sm:$0xff] }
  0xa2   : > { %1011 = vmatpush.msrb.mxu3 %v527_v5  ;;  %1057 = vmatpush.msra.mxu2 %v775_v9  ;;  %v619_v37 = vld [vmem:[#allocation2 + $0x4e8] sm:$0xff]  ;;  %v524_v9 = vld [vmem:[#allocation2 + $0x1f0] sm:$0xff] }
  0xa3   : > { %1017 = vmatpush.msra.mxu0 %v647_v6  ;;  %932 = vmatmul.f32.vlgmr.msra.gmra.mxu3 %v2810_v7  ;;  %v683_v38 = vld [vmem:[#allocation2 + $0x6e8] sm:$0xff] }
  0xa4   : > { %1037 = vmatpush.msra.mxu1 %v711_v8  ;;  %1076 = vmatpush.msra.mxu3 %v843_v10  ;;  %v747_v39 = vld [vmem:[#allocation2 + $0x8e8] sm:$0xff]  ;;  %v588_v10 = vld [vmem:[#allocation2 + $0x3f0] sm:$0xff] }
  0xa5   : > { %1018 = vmatpush.msra.mxu0 %v643_v11  ;;  %1058 = vmatpush.msra.mxu2 %v771_v13  ;;  %v815_v40 = vld [vmem:[#allocation2 + $0xb08] sm:$0xff]  ;;  %v652_v11 = vld [vmem:[#allocation2 + $0x5f0] sm:$0xff] }
  0xa6   : > { %1038 = vmatpush.msra.mxu1 %v707_v12  ;;  %1077 = vmatpush.msra.mxu3 %v839_v14  ;;  %v615_v41 = vld [vmem:[#allocation2 + $0x4c8] sm:$0xff]  ;;  %v520_v13 = vld [vmem:[#allocation2 + $0x1d0] sm:$0xff] }
  0xa7   : > { %1019 = vmatpush.msra.mxu0 %v639_v15  ;;  %1059 = vmatpush.msra.mxu2 %v767_v17  ;;  %v679_v42 = vld [vmem:[#allocation2 + $0x6c8] sm:$0xff]  ;;  %v584_v14 = vld [vmem:[#allocation2 + $0x3d0] sm:$0xff] }
  0xa8   : > { %1039 = vmatpush.msra.mxu1 %v703_v16  ;;  %1078 = vmatpush.msra.mxu3 %v835_v18  ;;  %v743_v43 = vld [vmem:[#allocation2 + $0x8c8] sm:$0xff]  ;;  %v648_v15 = vld [vmem:[#allocation2 + $0x5d0] sm:$0xff] }
  0xa9   : > { %1020 = vmatpush.msra.mxu0 %v635_v19  ;;  %1060 = vmatpush.msra.mxu2 %v763_v21  ;;  %v811_v44 = vld [vmem:[#allocation2 + $0xae8] sm:$0xff]  ;;  %v716_v16 = vld [vmem:[#allocation2 + $0x7f0] sm:$0xff] }
  0xaa   : > { %1040 = vmatpush.msra.mxu1 %v699_v20  ;;  %1079 = vmatpush.msra.mxu3 %v831_v22  ;;  %v611_v45 = vld [vmem:[#allocation2 + $0x4a8] sm:$0xff]  ;;  %v516_v17 = vld [vmem:[#allocation2 + $0x1b0] sm:$0xff] }
  0xab   : > { %952 = vmatmul.f32.vlgmr.msrb.gmra.mxu0 %v2814_v23  ;;  %1061 = vmatpush.msra.mxu2 %v759_v26  ;;  %v675_v46 = vld [vmem:[#allocation2 + $0x6a8] sm:$0xff]  ;;  %v580_v18 = vld [vmem:[#allocation2 + $0x3b0] sm:$0xff] }
  0xac   : > { %1041 = vmatpush.msra.mxu1 %v695_v24  ;;  %1021 = vmatpush.msra.mxu0 %v631_v25  ;;  %v739_v47 = vld [vmem:[#allocation2 + $0x8a8] sm:$0xff]  ;;  %v644_v19 = vld [vmem:[#allocation2 + $0x5b0] sm:$0xff] }
  0xad   : > { %1080 = vmatpush.msra.mxu3 %v827_v27  ;;  %972 = vmatmul.f32.vlgmr.msrb.gmra.mxu1 %v2817_v28  ;;  %v807_v48 = vld [vmem:[#allocation2 + $0xac8] sm:$0xff]  ;;  %v712_v20 = vld [vmem:[#allocation2 + $0x7d0] sm:$0xff] }
  0xae   : > { %1022 = vmatpush.msra.mxu0 %v627_v29  ;;  %1042 = vmatpush.msra.mxu1 %v691_v30  ;;  %v607_v49 = vld [vmem:[#allocation2 + $0x488] sm:$0xff]  ;;  %v512_v21 = vld [vmem:[#allocation2 + $0x190] sm:$0xff] }
  0xaf   : > { %1062 = vmatpush.msra.mxu2 %v755_v31  ;;  %1081 = vmatpush.msra.mxu3 %v823_v32  ;;  %v671_v50 = vld [vmem:[#allocation2 + $0x688] sm:$0xff]  ;;  %v576_v22 = vld [vmem:[#allocation2 + $0x390] sm:$0xff] }
  0xb0   : > { %1023 = vmatpush.msra.mxu0 %v623_v33  ;;  %1043 = vmatpush.msra.mxu1 %v687_v34  ;;  %v735_v51 = vld [vmem:[#allocation2 + $0x888] sm:$0xff]  ;;  %v640_v24 = vld [vmem:[#allocation2 + $0x590] sm:$0xff] }
  0xb1   : > { %1063 = vmatpush.msra.mxu2 %v751_v35  ;;  %1082 = vmatpush.msra.mxu3 %v819_v36  ;;  %v803_v52 = vld [vmem:[#allocation2 + $0xaa8] sm:$0xff]  ;;  %v708_v25 = vld [vmem:[#allocation2 + $0x7b0] sm:$0xff] }
  0xb2   : > { %1024 = vmatpush.msra.mxu0 %v619_v37  ;;  %1044 = vmatpush.msra.mxu1 %v683_v38  ;;  %v603_v53 = vld [vmem:[#allocation2 + $0x468] sm:$0xff]  ;;  %v508_v26 = vld [vmem:[#allocation2 + $0x170] sm:$0xff] }
  0xb3   : > { %1064 = vmatpush.msra.mxu2 %v747_v39  ;;  %1083 = vmatpush.msra.mxu3 %v815_v40  ;;  %v667_v54 = vld [vmem:[#allocation2 + $0x668] sm:$0xff]  ;;  %v572_v27 = vld [vmem:[#allocation2 + $0x370] sm:$0xff] }
  0xb4   : > { %1025 = vmatpush.msra.mxu0 %v615_v41  ;;  %1045 = vmatpush.msra.mxu1 %v679_v42  ;;  %v731_v55 = vld [vmem:[#allocation2 + $0x868] sm:$0xff]  ;;  %v636_v29 = vld [vmem:[#allocation2 + $0x570] sm:$0xff] }
  0xb5   : > { %1065 = vmatpush.msra.mxu2 %v743_v43  ;;  %1084 = vmatpush.msra.mxu3 %v811_v44  ;;  %v799_v56 = vld [vmem:[#allocation2 + $0xa88] sm:$0xff]  ;;  %v704_v30 = vld [vmem:[#allocation2 + $0x790] sm:$0xff] }
  0xb6   : > { %1026 = vmatpush.msra.mxu0 %v611_v45  ;;  %1046 = vmatpush.msra.mxu1 %v675_v46  ;;  %v599_v57 = vld [vmem:[#allocation2 + $0x448] sm:$0xff]  ;;  %v504_v31 = vld [vmem:[#allocation2 + $0x150] sm:$0xff] }
  0xb7   : > { %1066 = vmatpush.msra.mxu2 %v739_v47  ;;  %1085 = vmatpush.msra.mxu3 %v807_v48  ;;  %v663_v58 = vld [vmem:[#allocation2 + $0x648] sm:$0xff]  ;;  %v568_v32 = vld [vmem:[#allocation2 + $0x350] sm:$0xff] }
  0xb8   : > { %1027 = vmatpush.msra.mxu0 %v607_v49  ;;  %1047 = vmatpush.msra.mxu1 %v671_v50  ;;  %v727_v59 = vld [vmem:[#allocation2 + $0x848] sm:$0xff]  ;;  %v632_v33 = vld [vmem:[#allocation2 + $0x550] sm:$0xff] }
  0xb9   : > { %1067 = vmatpush.msra.mxu2 %v735_v51  ;;  %1086 = vmatpush.msra.mxu3 %v803_v52  ;;  %v795_v60 = vld [vmem:[#allocation2 + $0xa68] sm:$0xff]  ;;  %v700_v34 = vld [vmem:[#allocation2 + $0x770] sm:$0xff] }
  0xba   : > { %992 = vmatmul.f32.vlgmr.msrb.gmra.mxu2 %v2798_v63  ;;  %1028 = vmatpush.msra.mxu0 %v603_v53  ;;  %v595_v61 = vld [vmem:[#allocation2 + $0x428] sm:$0xff]  ;;  %v500_v35 = vld [vmem:[#allocation2 + $0x130] sm:$0xff] }
  0xbb   : > { %1048 = vmatpush.msra.mxu1 %v667_v54  ;;  %1068 = vmatpush.msra.mxu2 %v731_v55  ;;  %v659_v62 = vld [vmem:[#allocation2 + $0x628] sm:$0xff]  ;;  %v564_v36 = vld [vmem:[#allocation2 + $0x330] sm:$0xff] }
  0xbc   : > { %1087 = vmatpush.msra.mxu3 %v799_v56  ;;  %1029 = vmatpush.msra.mxu0 %v599_v57  ;;  %v723_v2 = vld [vmem:[#allocation2 + $0x828] sm:$0xff]  ;;  %v628_v37 = vld [vmem:[#allocation2 + $0x530] sm:$0xff] }
  0xbd   : > { %1012 = vmatmul.f32.vlgmr.msrb.gmra.mxu3 %v2801_v0  ;;  %1049 = vmatpush.msra.mxu1 %v663_v58  ;;  %v791_v3 = vld [vmem:[#allocation2 + $0xa48] sm:$0xff]  ;;  %v696_v38 = vld [vmem:[#allocation2 + $0x750] sm:$0xff] }
  0xbe   : > { %1069 = vmatpush.msra.mxu2 %v727_v59  ;;  %1088 = vmatpush.msra.mxu3 %v795_v60  ;;  %v591_v4 = vld [vmem:[#allocation2 + $0x408] sm:$0xff]  ;;  %v496_v39 = vld [vmem:[#allocation2 + $0x110] sm:$0xff] }
  0xbf   : > { %v655_v5 = vld [vmem:[#allocation2 + $0x608] sm:$0xff]  ;;  %1030 = vmatpush.msra.mxu0 %v595_v61  ;;  %1050 = vmatpush.msra.mxu1 %v659_v62  ;;  %v560_v40 = vld [vmem:[#allocation2 + $0x310] sm:$0xff] }
  0xc0   : > { %v719_v6 = vld [vmem:[#allocation2 + $0x808] sm:$0xff]  ;;  %1070 = vmatpush.msra.mxu2 %v723_v2  ;;  %1089 = vmatpush.msra.mxu3 %v791_v3  ;;  %v624_v41 = vld [vmem:[#allocation2 + $0x510] sm:$0xff] }
  0xc1   : > { %v787_v8 = vld [vmem:[#allocation2 + $0xa28] sm:$0xff]  ;;  %1031 = vmatpush.msra.mxu0 %v591_v4  ;;  %1051 = vmatpush.msra.mxu1 %v655_v5  ;;  %v692_v42 = vld [vmem:[#allocation2 + $0x730] sm:$0xff] }
  0xc2   : > { %1071 = vmatpush.msra.mxu2 %v719_v6  ;;  %1090 = vmatpush.msra.mxu3 %v787_v8  ;;  %v783_v12 = vld [vmem:[#allocation2 + $0xa08] sm:$0xff]  ;;  %v492_v43 = vld [vmem:[#allocation2 + $0xf0] sm:$0xff] }
  0xc3   : > { %1072 = vmatmul.f32.vlgmr.msra.gmra.mxu2 %v2814_v23  ;;  %1096 = vmatpush.msrb.mxu0 %v524_v9  ;;  %v556_v44 = vld [vmem:[#allocation2 + $0x2f0] sm:$0xff] }
  0xc4   : > { %1116 = vmatpush.msrb.mxu1 %v588_v10  ;;  %1136 = vmatpush.msrb.mxu2 %v652_v11  ;;  %v620_v45 = vld [vmem:[#allocation2 + $0x4f0] sm:$0xff] }
  0xc5   : > { %1091 = vmatpush.msra.mxu3 %v783_v12  ;;  %1032 = vmatmul.f32.vlgmr.msra.gmra.mxu0 %v2804_v1  ;;  %v688_v46 = vld [vmem:[#allocation2 + $0x710] sm:$0xff] }
  0xc6   : > { %1092 = vmatmul.f32.vlgmr.msra.gmra.mxu3 %v2817_v28  ;;  %1097 = vmatpush.msrb.mxu0 %v520_v13  ;;  %v488_v47 = vld [vmem:[#allocation2 + $0xd0] sm:$0xff] }
  0xc7   : > { %1117 = vmatpush.msrb.mxu1 %v584_v14  ;;  %1137 = vmatpush.msrb.mxu2 %v648_v15  ;;  %v552_v48 = vld [vmem:[#allocation2 + $0x2d0] sm:$0xff] }
  0xc8   : > { %1156 = vmatpush.msrb.mxu3 %v716_v16  ;;  %1052 = vmatmul.f32.vlgmr.msra.gmra.mxu1 %v2810_v7  ;;  %v616_v49 = vld [vmem:[#allocation2 + $0x4d0] sm:$0xff] }
  0xc9   : > { %1098 = vmatpush.msrb.mxu0 %v516_v17  ;;  %1118 = vmatpush.msrb.mxu1 %v580_v18  ;;  %v684_v50 = vld [vmem:[#allocation2 + $0x6f0] sm:$0xff]  ;;  %v525_v17 = vld [vmem:[#allocation2 + $0x1f8] sm:$0xff] }
  0xca   : > { %1138 = vmatpush.msrb.mxu2 %v644_v19  ;;  %1157 = vmatpush.msrb.mxu3 %v712_v20  ;;  %v484_v51 = vld [vmem:[#allocation2 + $0xb0] sm:$0xff] }
  0xcb   : > { %1099 = vmatpush.msrb.mxu0 %v512_v21  ;;  %1119 = vmatpush.msrb.mxu1 %v576_v22  ;;  %v548_v52 = vld [vmem:[#allocation2 + $0x2b0] sm:$0xff]  ;;  %v521_v21 = vld [vmem:[#allocation2 + $0x1d8] sm:$0xff] }
  0xcc   : > { %1139 = vmatpush.msrb.mxu2 %v640_v24  ;;  %1158 = vmatpush.msrb.mxu3 %v708_v25  ;;  %v612_v53 = vld [vmem:[#allocation2 + $0x4b0] sm:$0xff]  ;;  %v589_v22 = vld [vmem:[#allocation2 + $0x3f8] sm:$0xff] }
  0xcd   : > { %1100 = vmatpush.msrb.mxu0 %v508_v26  ;;  %1120 = vmatpush.msrb.mxu1 %v572_v27  ;;  %v680_v54 = vld [vmem:[#allocation2 + $0x6d0] sm:$0xff]  ;;  %v517_v26 = vld [vmem:[#allocation2 + $0x1b8] sm:$0xff] }
  0xce   : > { %1140 = vmatpush.msrb.mxu2 %v636_v29  ;;  %1159 = vmatpush.msrb.mxu3 %v704_v30  ;;  %v480_v55 = vld [vmem:[#allocation2 + $0x90] sm:$0xff]  ;;  %v585_v27 = vld [vmem:[#allocation2 + $0x3d8] sm:$0xff] }
  0xcf   : > { %1101 = vmatpush.msrb.mxu0 %v504_v31  ;;  %1121 = vmatpush.msrb.mxu1 %v568_v32  ;;  %v544_v56 = vld [vmem:[#allocation2 + $0x290] sm:$0xff]  ;;  %v513_v31 = vld [vmem:[#allocation2 + $0x198] sm:$0xff] }
  0xd0   : > { %1141 = vmatpush.msrb.mxu2 %v632_v33  ;;  %1160 = vmatpush.msrb.mxu3 %v700_v34  ;;  %v608_v57 = vld [vmem:[#allocation2 + $0x490] sm:$0xff]  ;;  %v581_v32 = vld [vmem:[#allocation2 + $0x3b8] sm:$0xff] }
  0xd1   : > { %1102 = vmatpush.msrb.mxu0 %v500_v35  ;;  %1122 = vmatpush.msrb.mxu1 %v564_v36  ;;  %v676_v58 = vld [vmem:[#allocation2 + $0x6b0] sm:$0xff]  ;;  %v509_v35 = vld [vmem:[#allocation2 + $0x178] sm:$0xff] }
  0xd2   : > { %1142 = vmatpush.msrb.mxu2 %v628_v37  ;;  %1161 = vmatpush.msrb.mxu3 %v696_v38  ;;  %v476_v59 = vld [vmem:[#allocation2 + $0x70] sm:$0xff]  ;;  %v577_v36 = vld [vmem:[#allocation2 + $0x398] sm:$0xff] }
  0xd3   : > { %1103 = vmatpush.msrb.mxu0 %v496_v39  ;;  %1123 = vmatpush.msrb.mxu1 %v560_v40  ;;  %v540_v60 = vld [vmem:[#allocation2 + $0x270] sm:$0xff]  ;;  %v505_v39 = vld [vmem:[#allocation2 + $0x158] sm:$0xff] }
  0xd4   : > { %1143 = vmatpush.msrb.mxu2 %v624_v41  ;;  %1162 = vmatpush.msrb.mxu3 %v692_v42  ;;  %v604_v61 = vld [vmem:[#allocation2 + $0x470] sm:$0xff]  ;;  %v573_v40 = vld [vmem:[#allocation2 + $0x378] sm:$0xff] }
  0xd5   : > { %1104 = vmatpush.msrb.mxu0 %v492_v43  ;;  %1124 = vmatpush.msrb.mxu1 %v556_v44  ;;  %v672_v62 = vld [vmem:[#allocation2 + $0x690] sm:$0xff]  ;;  %v501_v43 = vld [vmem:[#allocation2 + $0x138] sm:$0xff] }
  0xd6   : > { %1144 = vmatpush.msrb.mxu2 %v620_v45  ;;  %1163 = vmatpush.msrb.mxu3 %v688_v46  ;;  %v472_v2 = vld [vmem:[#allocation2 + $0x50] sm:$0xff]  ;;  %v569_v44 = vld [vmem:[#allocation2 + $0x358] sm:$0xff] }
  0xd7   : > { %1105 = vmatpush.msrb.mxu0 %v488_v47  ;;  %1125 = vmatpush.msrb.mxu1 %v552_v48  ;;  %v536_v3 = vld [vmem:[#allocation2 + $0x250] sm:$0xff]  ;;  %v497_v47 = vld [vmem:[#allocation2 + $0x118] sm:$0xff] }
  0xd8   : > { %1145 = vmatpush.msrb.mxu2 %v616_v49  ;;  %1164 = vmatpush.msrb.mxu3 %v684_v50  ;;  %v600_v4 = vld [vmem:[#allocation2 + $0x450] sm:$0xff]  ;;  %v565_v48 = vld [vmem:[#allocation2 + $0x338] sm:$0xff] }
  0xd9   : > { %1106 = vmatpush.msrb.mxu0 %v484_v51  ;;  %1126 = vmatpush.msrb.mxu1 %v548_v52  ;;  %v668_v5 = vld [vmem:[#allocation2 + $0x670] sm:$0xff]  ;;  %v493_v51 = vld [vmem:[#allocation2 + $0xf8] sm:$0xff] }
  0xda   : > { %1146 = vmatpush.msrb.mxu2 %v612_v53  ;;  %1165 = vmatpush.msrb.mxu3 %v680_v54  ;;  %v468_v6 = vld [vmem:[#allocation2 + $0x30] sm:$0xff]  ;;  %v561_v52 = vld [vmem:[#allocation2 + $0x318] sm:$0xff] }
  0xdb   : > { %1107 = vmatpush.msrb.mxu0 %v480_v55  ;;  %1127 = vmatpush.msrb.mxu1 %v544_v56  ;;  %v532_v8 = vld [vmem:[#allocation2 + $0x230] sm:$0xff]  ;;  %v489_v55 = vld [vmem:[#allocation2 + $0xd8] sm:$0xff] }
  0xdc   : > { %1147 = vmatpush.msrb.mxu2 %v608_v57  ;;  %1166 = vmatpush.msrb.mxu3 %v676_v58  ;;  %v596_v9 = vld [vmem:[#allocation2 + $0x430] sm:$0xff]  ;;  %v557_v56 = vld [vmem:[#allocation2 + $0x2f8] sm:$0xff] }
  0xdd   : > { %1108 = vmatpush.msrb.mxu0 %v476_v59  ;;  %1128 = vmatpush.msrb.mxu1 %v540_v60  ;;  %v664_v10 = vld [vmem:[#allocation2 + $0x650] sm:$0xff]  ;;  %v485_v59 = vld [vmem:[#allocation2 + $0xb8] sm:$0xff] }
  0xde   : > { %1148 = vmatpush.msrb.mxu2 %v604_v61  ;;  %1167 = vmatpush.msrb.mxu3 %v672_v62  ;;  %v464_v11 = vld [vmem:[#allocation2 + $0x10] sm:$0xff]  ;;  %v553_v60 = vld [vmem:[#allocation2 + $0x2d8] sm:$0xff] }
  0xdf   : > { %1109 = vmatpush.msrb.mxu0 %v472_v2  ;;  %1129 = vmatpush.msrb.mxu1 %v536_v3  ;;  %v528_v12 = vld [vmem:[#allocation2 + $0x210] sm:$0xff]  ;;  %v481_v2 = vld [vmem:[#allocation2 + $0x98] sm:$0xff] }
  0xe0   : > { %1149 = vmatpush.msrb.mxu2 %v600_v4  ;;  %1168 = vmatpush.msrb.mxu3 %v668_v5  ;;  %v592_v13 = vld [vmem:[#allocation2 + $0x410] sm:$0xff]  ;;  %v549_v3 = vld [vmem:[#allocation2 + $0x2b8] sm:$0xff] }
  0xe1   : > { %1110 = vmatpush.msrb.mxu0 %v468_v6  ;;  %1130 = vmatpush.msrb.mxu1 %v532_v8  ;;  %v660_v14 = vld [vmem:[#allocation2 + $0x630] sm:$0xff]  ;;  %v477_v6 = vld [vmem:[#allocation2 + $0x78] sm:$0xff] }
  0xe2   : > { %1150 = vmatpush.msrb.mxu2 %v596_v9  ;;  %1169 = vmatpush.msrb.mxu3 %v664_v10  ;;  %v780_v15 = vld [vmem:[#allocation2 + $0x9f0] sm:$0xff]  ;;  %v545_v8 = vld [vmem:[#allocation2 + $0x298] sm:$0xff] }
  0xe3   : > { %v844_v16 = vld [vmem:[#allocation2 + $0xbf0] sm:$0xff]  ;;  %1111 = vmatpush.msrb.mxu0 %v464_v11  ;;  %1131 = vmatpush.msrb.mxu1 %v528_v12  ;;  %v473_v11 = vld [vmem:[#allocation2 + $0x58] sm:$0xff] }
  0xe4   : > { %v656_v18 = vld [vmem:[#allocation2 + $0x610] sm:$0xff]  ;;  %1151 = vmatpush.msrb.mxu2 %v592_v13  ;;  %1170 = vmatpush.msrb.mxu3 %v660_v14  ;;  %v541_v12 = vld [vmem:[#allocation2 + $0x278] sm:$0xff] }
  0xe5   : > { %v776_v19 = vld [vmem:[#allocation2 + $0x9d0] sm:$0xff]  ;;  %1176 = vmatpush.msra.mxu0 %v780_v15  ;;  %1196 = vmatpush.msra.mxu1 %v844_v16  ;;  %v469_v14 = vld [vmem:[#allocation2 + $0x38] sm:$0xff] }
  0xe6   : > { %v840_v20 = vld [vmem:[#allocation2 + $0xbd0] sm:$0xff]  ;;  %1216 = vmatpush.msra.mxu2 %v525_v17  ;;  %1171 = vmatpush.msrb.mxu3 %v656_v18  ;;  %v537_v15 = vld [vmem:[#allocation2 + $0x258] sm:$0xff] }
  0xe7   : > { %v772_v24 = vld [vmem:[#allocation2 + $0x9b0] sm:$0xff]  ;;  %1177 = vmatpush.msra.mxu0 %v776_v19  ;;  %1197 = vmatpush.msra.mxu1 %v840_v20  ;;  %v465_v16 = vld [vmem:[#allocation2 + $0x18] sm:$0xff] }
  0xe8   : > { %v836_v25 = vld [vmem:[#allocation2 + $0xbb0] sm:$0xff]  ;;  %1217 = vmatpush.msra.mxu2 %v521_v21  ;;  %1236 = vmatpush.msra.mxu3 %v589_v22  ;;  %v533_v17 = vld [vmem:[#allocation2 + $0x238] sm:$0xff] }
  0xe9   : > { %v768_v29 = vld [vmem:[#allocation2 + $0x990] sm:$0xff]  ;;  %1178 = vmatpush.msra.mxu0 %v772_v24  ;;  %1198 = vmatpush.msra.mxu1 %v836_v25  ;;  %v717_v18 = vld [vmem:[#allocation2 + $0x7f8] sm:$0xff] }
  0xea   : > { %v832_v30 = vld [vmem:[#allocation2 + $0xb90] sm:$0xff]  ;;  %1218 = vmatpush.msra.mxu2 %v517_v26  ;;  %1237 = vmatpush.msra.mxu3 %v585_v27  ;;  %v781_v19 = vld [vmem:[#allocation2 + $0x9f8] sm:$0xff] }
  0xeb   : > { %v764_v33 = vld [vmem:[#allocation2 + $0x970] sm:$0xff]  ;;  %1179 = vmatpush.msra.mxu0 %v768_v29  ;;  %1199 = vmatpush.msra.mxu1 %v832_v30  ;;  %v529_v20 = vld [vmem:[#allocation2 + $0x218] sm:$0xff] }
  0xec   : > { %v828_v34 = vld [vmem:[#allocation2 + $0xb70] sm:$0xff]  ;;  %1219 = vmatpush.msra.mxu2 %v513_v31  ;;  %1238 = vmatpush.msra.mxu3 %v581_v32  ;;  %v649_v21 = vld [vmem:[#allocation2 + $0x5d8] sm:$0xff] }
  0xed   : > { %v760_v37 = vld [vmem:[#allocation2 + $0x950] sm:$0xff]  ;;  %1180 = vmatpush.msra.mxu0 %v764_v33  ;;  %1200 = vmatpush.msra.mxu1 %v828_v34  ;;  %v713_v22 = vld [vmem:[#allocation2 + $0x7d8] sm:$0xff] }
  0xee   : > { %v824_v38 = vld [vmem:[#allocation2 + $0xb50] sm:$0xff]  ;;  %1220 = vmatpush.msra.mxu2 %v509_v35  ;;  %1239 = vmatpush.msra.mxu3 %v577_v36  ;;  %v777_v24 = vld [vmem:[#allocation2 + $0x9d8] sm:$0xff] }
  0xef   : > { %v756_v41 = vld [vmem:[#allocation2 + $0x930] sm:$0xff]  ;;  %1181 = vmatpush.msra.mxu0 %v760_v37  ;;  %1201 = vmatpush.msra.mxu1 %v824_v38  ;;  %v845_v25 = vld [vmem:[#allocation2 + $0xbf8] sm:$0xff] }
  0xf0   : > { %v820_v42 = vld [vmem:[#allocation2 + $0xb30] sm:$0xff]  ;;  %1221 = vmatpush.msra.mxu2 %v505_v39  ;;  %1240 = vmatpush.msra.mxu3 %v573_v40  ;;  %v645_v26 = vld [vmem:[#allocation2 + $0x5b8] sm:$0xff] }
  0xf1   : > { %v752_v45 = vld [vmem:[#allocation2 + $0x910] sm:$0xff]  ;;  %1182 = vmatpush.msra.mxu0 %v756_v41  ;;  %1202 = vmatpush.msra.mxu1 %v820_v42  ;;  %v709_v27 = vld [vmem:[#allocation2 + $0x7b8] sm:$0xff] }
  0xf2   : > { %v816_v46 = vld [vmem:[#allocation2 + $0xb10] sm:$0xff]  ;;  %1222 = vmatpush.msra.mxu2 %v501_v43  ;;  %1241 = vmatpush.msra.mxu3 %v569_v44  ;;  %v773_v29 = vld [vmem:[#allocation2 + $0x9b8] sm:$0xff] }
  0xf3   : > { %v748_v49 = vld [vmem:[#allocation2 + $0x8f0] sm:$0xff]  ;;  %1183 = vmatpush.msra.mxu0 %v752_v45  ;;  %1203 = vmatpush.msra.mxu1 %v816_v46  ;;  %v841_v30 = vld [vmem:[#allocation2 + $0xbd8] sm:$0xff] }
  0xf4   : > { %v812_v50 = vld [vmem:[#allocation2 + $0xaf0] sm:$0xff]  ;;  %1223 = vmatpush.msra.mxu2 %v497_v47  ;;  %1242 = vmatpush.msra.mxu3 %v565_v48  ;;  %v641_v31 = vld [vmem:[#allocation2 + $0x598] sm:$0xff] }
  0xf5   : > { %v744_v53 = vld [vmem:[#allocation2 + $0x8d0] sm:$0xff]  ;;  %1184 = vmatpush.msra.mxu0 %v748_v49  ;;  %1204 = vmatpush.msra.mxu1 %v812_v50  ;;  %v705_v32 = vld [vmem:[#allocation2 + $0x798] sm:$0xff] }
  0xf6   : > { %v808_v54 = vld [vmem:[#allocation2 + $0xad0] sm:$0xff]  ;;  %1224 = vmatpush.msra.mxu2 %v493_v51  ;;  %1243 = vmatpush.msra.mxu3 %v561_v52  ;;  %v769_v33 = vld [vmem:[#allocation2 + $0x998] sm:$0xff] }
  0xf7   : > { %v740_v57 = vld [vmem:[#allocation2 + $0x8b0] sm:$0xff]  ;;  %1185 = vmatpush.msra.mxu0 %v744_v53  ;;  %1205 = vmatpush.msra.mxu1 %v808_v54  ;;  %v837_v34 = vld [vmem:[#allocation2 + $0xbb8] sm:$0xff] }
  0xf8   : > { %v804_v58 = vld [vmem:[#allocation2 + $0xab0] sm:$0xff]  ;;  %1225 = vmatpush.msra.mxu2 %v489_v55  ;;  %1244 = vmatpush.msra.mxu3 %v557_v56  ;;  %v637_v35 = vld [vmem:[#allocation2 + $0x578] sm:$0xff] }
  0xf9   : > { %v736_v61 = vld [vmem:[#allocation2 + $0x890] sm:$0xff]  ;;  %1186 = vmatpush.msra.mxu0 %v740_v57  ;;  %1206 = vmatpush.msra.mxu1 %v804_v58  ;;  %v701_v36 = vld [vmem:[#allocation2 + $0x778] sm:$0xff] }
  0xfa   : > { %v800_v62 = vld [vmem:[#allocation2 + $0xa90] sm:$0xff]  ;;  %1226 = vmatpush.msra.mxu2 %v485_v59  ;;  %1245 = vmatpush.msra.mxu3 %v553_v60  ;;  %v765_v37 = vld [vmem:[#allocation2 + $0x978] sm:$0xff] }
  0xfb   : > { %1152 = vmatmul.f32.vlgmr.msrb.gmra.mxu2 %v2804_v1  ;;  %1187 = vmatpush.msra.mxu0 %v736_v61  ;;  %v732_v4 = vld [vmem:[#allocation2 + $0x870] sm:$0xff]  ;;  %v833_v38 = vld [vmem:[#allocation2 + $0xb98] sm:$0xff] }
  0xfc   : > { %1207 = vmatpush.msra.mxu1 %v800_v62  ;;  %1227 = vmatpush.msra.mxu2 %v481_v2  ;;  %v796_v5 = vld [vmem:[#allocation2 + $0xa70] sm:$0xff]  ;;  %v633_v39 = vld [vmem:[#allocation2 + $0x558] sm:$0xff] }
  0xfd   : > { %1246 = vmatpush.msra.mxu3 %v549_v3  ;;  %1112 = vmatmul.f32.vlgmr.msrb.gmra.mxu0 %v2798_v63  ;;  %v728_v9 = vld [vmem:[#allocation2 + $0x850] sm:$0xff]  ;;  %v697_v40 = vld [vmem:[#allocation2 + $0x758] sm:$0xff] }
  0xfe   : > { %1172 = vmatmul.f32.vlgmr.msrb.gmra.mxu3 %v2810_v7  ;;  %1188 = vmatpush.msra.mxu0 %v732_v4  ;;  %v792_v10 = vld [vmem:[#allocation2 + $0xa50] sm:$0xff]  ;;  %v761_v41 = vld [vmem:[#allocation2 + $0x958] sm:$0xff] }
  0xff   : > { %1208 = vmatpush.msra.mxu1 %v796_v5  ;;  %1228 = vmatpush.msra.mxu2 %v477_v6  ;;  %v724_v1 = vld [vmem:[#allocation2 + $0x830] sm:$0xff]  ;;  %v829_v42 = vld [vmem:[#allocation2 + $0xb78] sm:$0xff] }
 0x100   : > { %1247 = vmatpush.msra.mxu3 %v545_v8  ;;  %1132 = vmatmul.f32.vlgmr.msrb.gmra.mxu1 %v2801_v0  ;;  %v788_v13 = vld [vmem:[#allocation2 + $0xa30] sm:$0xff]  ;;  %v653_v0 = vld [vmem:[#allocation2 + $0x5f8] sm:$0xff] }
 0x101   : > { %1189 = vmatpush.msra.mxu0 %v728_v9  ;;  %1209 = vmatpush.msra.mxu1 %v792_v10  ;;  %v720_v63 = vld [vmem:[#allocation2 + $0x810] sm:$0xff]  ;;  %v629_v43 = vld [vmem:[#allocation2 + $0x538] sm:$0xff] }
 0x102   : > { %1229 = vmatpush.msra.mxu2 %v473_v11  ;;  %1248 = vmatpush.msra.mxu3 %v541_v12  ;;  %v784_v7 = vld [vmem:[#allocation2 + $0xa10] sm:$0xff]  ;;  %v693_v44 = vld [vmem:[#allocation2 + $0x738] sm:$0xff]  ;;  %v2270_v12 = vld [vmem:[%s2795_s18] sm:$0xff] }
 0x103   : > { %1190 = vmatpush.msra.mxu0 %v724_v1  ;;  %1210 = vmatpush.msra.mxu1 %v788_v13  ;;  %v757_v45 = vld [vmem:[#allocation2 + $0x938] sm:$0xff] }
 0x104   : > { %1230 = vmatpush.msra.mxu2 %v469_v14  ;;  %1249 = vmatpush.msra.mxu3 %v537_v15  ;;  %v825_v46 = vld [vmem:[#allocation2 + $0xb58] sm:$0xff] }
 0x105   : > { %1191 = vmatpush.msra.mxu0 %v720_v63  ;;  %1211 = vmatpush.msra.mxu1 %v784_v7  ;;  %v625_v47 = vld [vmem:[#allocation2 + $0x518] sm:$0xff]  ;;  %v2271_v7 = vld [vmem:[%s2795_s18 + $0x8] sm:$0xff] }
 0x106   : > { %1231 = vmatpush.msra.mxu2 %v465_v16  ;;  %1250 = vmatpush.msra.mxu3 %v533_v17  ;;  %v689_v48 = vld [vmem:[#allocation2 + $0x718] sm:$0xff] }
 0x107   : > { %1192 = vmatmul.f32.vlgmr.msra.gmra.mxu0 %v2814_v23  ;;  %1276 = vmatpush.msrb.mxu1 %v717_v18  ;;  %v753_v49 = vld [vmem:[#allocation2 + $0x918] sm:$0xff] }
 0x108   : > { %1256 = vmatpush.msrb.mxu0 %v653_v0  ;;  %1296 = vmatpush.msrb.mxu2 %v781_v19  ;;  %v821_v50 = vld [vmem:[#allocation2 + $0xb38] sm:$0xff] }
 0x109   : > { %1251 = vmatpush.msra.mxu3 %v529_v20  ;;  %1212 = vmatmul.f32.vlgmr.msra.gmra.mxu1 %v2817_v28  ;;  %v621_v51 = vld [vmem:[#allocation2 + $0x4f8] sm:$0xff] }
 0x10a   : > { %1257 = vmatpush.msrb.mxu0 %v649_v21  ;;  %1277 = vmatpush.msrb.mxu1 %v713_v22  ;;  %v685_v52 = vld [vmem:[#allocation2 + $0x6f8] sm:$0xff]  ;;  %v1385_v21 = vld [vmem:[#allocation7 + $0x168] sm:$0xff] }
 0x10b   : > { %1297 = vmatpush.msrb.mxu2 %v777_v24  ;;  %1316 = vmatpush.msrb.mxu3 %v845_v25  ;;  %v749_v53 = vld [vmem:[#allocation2 + $0x8f8] sm:$0xff]  ;;  %v1433_v22 = vld [vmem:[#allocation7 + $0x2e8] sm:$0xff]  ;;  %v2835_v25 = vld [vmem:[#allocation5] sm:$0xf] }
 0x10c   : > { %1258 = vmatpush.msrb.mxu0 %v645_v26  ;;  %1278 = vmatpush.msrb.mxu1 %v709_v27  ;;  %v817_v54 = vld [vmem:[#allocation2 + $0xb18] sm:$0xff] }
 0x10d   : > { %1298 = vmatpush.msrb.mxu2 %v773_v29  ;;  %1317 = vmatpush.msrb.mxu3 %v841_v30  ;;  %v617_v55 = vld [vmem:[#allocation2 + $0x4d8] sm:$0xff]  ;;  %v2272_v29 = vld [vmem:[%s2795_s18 + $0x10] sm:$0xff]  ;;  %v848_v30 = vperm.slane %v2835_v25, 0 }
 0x10e   : > { %1259 = vmatpush.msrb.mxu0 %v641_v31  ;;  %1279 = vmatpush.msrb.mxu1 %v705_v32  ;;  %v681_v56 = vld [vmem:[#allocation2 + $0x6d8] sm:$0xff] }
 0x10f   : > { %1299 = vmatpush.msrb.mxu2 %v769_v33  ;;  %1318 = vmatpush.msrb.mxu3 %v837_v34  ;;  %v745_v57 = vld [vmem:[#allocation2 + $0x8d8] sm:$0xff] }
 0x110   : > { %1260 = vmatpush.msrb.mxu0 %v637_v35  ;;  %1280 = vmatpush.msrb.mxu1 %v701_v36  ;;  %v813_v58 = vld [vmem:[#allocation2 + $0xaf8] sm:$0xff]  ;;  %v1376_v35 = vld [vmem:[#allocation7 + $0x120] sm:$0xff] }
 0x111   : > { %1300 = vmatpush.msrb.mxu2 %v765_v37  ;;  %1319 = vmatpush.msrb.mxu3 %v833_v38  ;;  %v613_v59 = vld [vmem:[#allocation2 + $0x4b8] sm:$0xff]  ;;  %v1373_v37 = vld [vmem:[#allocation7 + $0x108] sm:$0xff] }
 0x112   : > { %1261 = vmatpush.msrb.mxu0 %v633_v39  ;;  %1281 = vmatpush.msrb.mxu1 %v697_v40  ;;  %v677_v60 = vld [vmem:[#allocation2 + $0x6b8] sm:$0xff]  ;;  %v1421_v38 = vld [vmem:[#allocation7 + $0x288] sm:$0xff]  ;;  %v893_v39 = vpop.f32.mrf.mxu1 }
 0x113   : > { %1301 = vmatpush.msrb.mxu2 %v761_v41  ;;  %1320 = vmatpush.msrb.mxu3 %v829_v42  ;;  %v741_v61 = vld [vmem:[#allocation2 + $0x8b8] sm:$0xff] }
 0x114   : > { %1262 = vmatpush.msrb.mxu0 %v629_v43  ;;  %1282 = vmatpush.msrb.mxu1 %v693_v44  ;;  %v809_v62 = vld [vmem:[#allocation2 + $0xad8] sm:$0xff] }
 0x115   : > { %1302 = vmatpush.msrb.mxu2 %v757_v45  ;;  %1321 = vmatpush.msrb.mxu3 %v825_v46  ;;  %v609_v2 = vld [vmem:[#allocation2 + $0x498] sm:$0xff]  ;;  %v913_v46 = vpop.f32.mrf.mxu2 }
 0x116   : > { %1263 = vmatpush.msrb.mxu0 %v625_v47  ;;  %1283 = vmatpush.msrb.mxu1 %v689_v48  ;;  %v673_v3 = vld [vmem:[#allocation2 + $0x698] sm:$0xff]  ;;  %v1364_v48 = vld [vmem:[#allocation7 + $0xc0] sm:$0xff] }
 0x117   : > { %1303 = vmatpush.msrb.mxu2 %v753_v49  ;;  %1322 = vmatpush.msrb.mxu3 %v821_v50  ;;  %v737_v4 = vld [vmem:[#allocation2 + $0x898] sm:$0xff]  ;;  %v1412_v49 = vld [vmem:[#allocation7 + $0x240] sm:$0xff] }
 0x118   : > { %1264 = vmatpush.msrb.mxu0 %v621_v51  ;;  %1284 = vmatpush.msrb.mxu1 %v685_v52  ;;  %v805_v5 = vld [vmem:[#allocation2 + $0xab8] sm:$0xff]  ;;  %v1472_v50 = vld [vmem:[#allocation7 + $0x420] sm:$0xff]  ;;  %v1361_v52 = vld [vmem:[#allocation7 + $0xa8] sm:$0xff] }
 0x119   : > { %1304 = vmatpush.msrb.mxu2 %v749_v53  ;;  %1323 = vmatpush.msrb.mxu3 %v817_v54  ;;  %v605_v6 = vld [vmem:[#allocation2 + $0x478] sm:$0xff]  ;;  %v1409_v53 = vld [vmem:[#allocation7 + $0x228] sm:$0xff] }
 0x11a   : > { %1265 = vmatpush.msrb.mxu0 %v617_v55  ;;  %1285 = vmatpush.msrb.mxu1 %v681_v56  ;;  %v669_v8 = vld [vmem:[#allocation2 + $0x678] sm:$0xff]  ;;  %v1469_v55 = vld [vmem:[#allocation7 + $0x408] sm:$0xff] }
 0x11b   : > { %1305 = vmatpush.msrb.mxu2 %v745_v57  ;;  %1324 = vmatpush.msrb.mxu3 %v813_v58  ;;  %v733_v9 = vld [vmem:[#allocation2 + $0x878] sm:$0xff] }
 0x11c   : > { %1266 = vmatpush.msrb.mxu0 %v613_v59  ;;  %1286 = vmatpush.msrb.mxu1 %v677_v60  ;;  %v801_v10 = vld [vmem:[#allocation2 + $0xa98] sm:$0xff]  ;;  %v849_v59 = vperm.slane %v2835_v25, 1 }
 0x11d   : > { %1306 = vmatpush.msrb.mxu2 %v741_v61  ;;  %1325 = vmatpush.msrb.mxu3 %v809_v62  ;;  %v601_v11 = vld [vmem:[#allocation2 + $0x458] sm:$0xff]  ;;  %v873_v33 = vpop.f32.mrf.mxu0 }
 0x11e   : > { %1267 = vmatpush.msrb.mxu0 %v609_v2  ;;  %1287 = vmatpush.msrb.mxu1 %v673_v3  ;;  %v665_v1 = vld [vmem:[#allocation2 + $0x658] sm:$0xff]  ;;  %v874_v36 = vadd.f32 %v873_v33, %v848_v30 }
 0x11f   : > { %1307 = vmatpush.msrb.mxu2 %v737_v4  ;;  %1326 = vmatpush.msrb.mxu3 %v805_v5  ;;  %v729_v13 = vld [vmem:[#allocation2 + $0x858] sm:$0xff]  ;;  %v1352_v5 = vld [vmem:[#allocation7 + $0x60] sm:$0xff] }
 0x120   : > { %1232 = vmatmul.f32.vlgmr.msra.gmra.mxu2 %v2270_v12  ;;  %1268 = vmatpush.msrb.mxu0 %v605_v6  ;;  %v797_v14 = vld [vmem:[#allocation2 + $0xa78] sm:$0xff]  ;;  %v894_v43 = vadd.f32 %v893_v39, %v874_v36  ;;  %v1400_v6 = vld [vmem:[#allocation7 + $0x1e0] sm:$0xff]  ;;  %v1349_v12 = vld [vmem:[#allocation7 + $0x48] sm:$0xff] }
 0x121   : > { %1288 = vmatpush.msrb.mxu1 %v669_v8  ;;  %1308 = vmatpush.msrb.mxu2 %v733_v9  ;;  %v597_v15 = vld [vmem:[#allocation2 + $0x438] sm:$0xff]  ;;  %v1445_v39 = vld [vmem:[#allocation7 + $0x348] sm:$0xff] }
 0x122   : > { %1327 = vmatpush.msrb.mxu3 %v801_v10  ;;  %1269 = vmatpush.msrb.mxu0 %v601_v11  ;;  %v661_v63 = vld [vmem:[#allocation2 + $0x638] sm:$0xff]  ;;  %v914_v51 = vadd.f32 %v913_v46, %v894_v43  ;;  %v1460_v10 = vld [vmem:[#allocation7 + $0x3c0] sm:$0xff]  ;;  %v1377_v43 = vld [vmem:[#allocation7 + $0x128] sm:$0xff] }
 0x123   : > { %1252 = vmatmul.f32.vlgmr.msra.gmra.mxu3 %v2271_v7  ;;  %1289 = vmatpush.msrb.mxu1 %v665_v1  ;;  %v725_v16 = vld [vmem:[#allocation2 + $0x838] sm:$0xff]  ;;  %v1397_v1 = vld [vmem:[#allocation7 + $0x1c8] sm:$0xff] }
 0x124   : > { %v793_v17 = vld [vmem:[#allocation2 + $0xa58] sm:$0xff]  ;;  %1309 = vmatpush.msrb.mxu2 %v729_v13  ;;  %1328 = vmatpush.msrb.mxu3 %v797_v14  ;;  %v1457_v14 = vld [vmem:[#allocation7 + $0x3a8] sm:$0xff] }
 0x125   : > { %v593_v18 = vld [vmem:[#allocation2 + $0x418] sm:$0xff]  ;;  %1270 = vmatpush.msrb.mxu0 %v597_v15  ;;  %1290 = vmatpush.msrb.mxu1 %v661_v63 }
 0x126   : > { %v657_v0 = vld [vmem:[#allocation2 + $0x618] sm:$0xff]  ;;  %1310 = vmatpush.msrb.mxu2 %v725_v16  ;;  %1329 = vmatpush.msrb.mxu3 %v793_v17  ;;  %v933_v54 = vpop.f32.mrf.mxu3 }
 0x127   : > { %v721_v19 = vld [vmem:[#allocation2 + $0x818] sm:$0xff]  ;;  %1271 = vmatpush.msrb.mxu0 %v593_v18  ;;  %1291 = vmatpush.msrb.mxu1 %v657_v0  ;;  %v934_v61 = vadd.f32 %v933_v54, %v914_v51  ;;  %v1416_v51 = vld [vmem:[#allocation7 + $0x260] sm:$0xff]  ;;  %v1413_v54 = vld [vmem:[#allocation7 + $0x248] sm:$0xff] }
 0x128   : > { %v789_v20 = vld [vmem:[#allocation2 + $0xa38] sm:$0xff]  ;;  %1311 = vmatpush.msrb.mxu2 %v721_v19  ;;  %1272 = vmatmul.f32.vlgmr.msrb.gmra.mxu0 %v2272_v29  ;;  %v953_v58 = vpop.f32.mrf.mxu0 }
 0x129   : > { %v785_v24 = vld [vmem:[#allocation2 + $0xa18] sm:$0xff]  ;;  %1330 = vmatpush.msrb.mxu3 %v789_v20  ;;  %1312 = vmatmul.f32.vlgmr.msrb.gmra.mxu2 %v2814_v23  ;;  %v1424_v23 = vld [vmem:[#allocation7 + $0x2a0] sm:$0xff]  ;;  %v954_v11 = vadd.f32 %v953_v58, %v934_v61  ;;  %v1529_v58 = vld [vmem:[#allocation7 + $0x5e8] sm:$0xff] }
 0x12a   : > { %1540 = vmatpush.msra.mxu0 %v1385_v21  ;;  %v1382_v26 = vld [vmem:[#allocation7 + $0x150] sm:$0xff]  ;;  %1560 = vmatpush.msra.mxu1 %v1433_v22  ;;  %v1379_v31 = vld [vmem:[#allocation7 + $0x138] sm:$0xff]  ;;  %v973_v4 = vpop.f32.mrf.mxu1  ;;  %v1340_v22 = vld [vmem:[#allocation7] sm:$0xff] }
 0x12b   : > { %v1430_v27 = vld [vmem:[#allocation7 + $0x2d0] sm:$0xff]  ;;  %1331 = vmatpush.msrb.mxu3 %v785_v24  ;;  %v1427_v32 = vld [vmem:[#allocation7 + $0x2b8] sm:$0xff]  ;;  %v974_v18 = vadd.f32 %v973_v4, %v954_v11  ;;  %v1388_v24 = vld [vmem:[#allocation7 + $0x180] sm:$0xff] }
 0x12c   : > { %1332 = vmatmul.f32.vlgmr.msrb.gmra.mxu3 %v2817_v28  ;;  %1541 = vmatpush.msra.mxu0 %v1382_v26  ;;  %v2273_v34 = vld [vmem:[%s2795_s18 + $0x18] sm:$0xff]  ;;  %v1481_v28 = vld [vmem:[#allocation7 + $0x468] sm:$0xff]  ;;  %v1404_v4 = vld [vmem:[#allocation7 + $0x200] sm:$0xff] }
 0x12d   : > { %1561 = vmatpush.msra.mxu1 %v1430_v27  ;;  %v1370_v40 = vld [vmem:[#allocation7 + $0xf0] sm:$0xff]  ;;  %1580 = vmatpush.msra.mxu2 %v1481_v28  ;;  %v1367_v44 = vld [vmem:[#allocation7 + $0xd8] sm:$0xff]  ;;  %v1380_v28 = vld [vmem:[#allocation7 + $0x140] sm:$0xff] }
 0x12e   : > { %1292 = vmatmul.f32.vlgmr.msrb.gmra.mxu1 %v2273_v34  ;;  %1542 = vmatpush.msra.mxu0 %v1379_v31  ;;  %v1418_v41 = vld [vmem:[#allocation7 + $0x270] sm:$0xff]  ;;  %v1415_v45 = vld [vmem:[#allocation7 + $0x258] sm:$0xff]  ;;  %v1448_v31 = vld [vmem:[#allocation7 + $0x360] sm:$0xff] }
 0x12f   : > { %1562 = vmatpush.msra.mxu1 %v1427_v32  ;;  %v1478_v42 = vld [vmem:[#allocation7 + $0x450] sm:$0xff]  ;;  %v1475_v47 = vld [vmem:[#allocation7 + $0x438] sm:$0xff]  ;;  %v2843_v32 = vmax.f32 %v974_v18, 0.0  ;;  %1600 = vmatpush.msra.mxu3 %v1529_v58  ;;  %v1464_v11 = vld [vmem:[#allocation7 + $0x3e0] sm:$0xff] }
 0x130   : > { %1543 = vmatpush.msra.mxu0 %v1376_v35  ;;  %1581 = vmatpush.msra.mxu2 %v1478_v42  ;;  %v1358_v56 = vld [vmem:[#allocation7 + $0x90] sm:$0xff]  ;;  %v1355_v62 = vld [vmem:[#allocation7 + $0x78] sm:$0xff]  ;;  %v1392_v18 = vld [vmem:[#allocation7 + $0x1a0] sm:$0xff] }
 0x131   : > { %1563 = vmatpush.msra.mxu1 %v1424_v23  ;;  %v1406_v57 = vld [vmem:[#allocation7 + $0x210] sm:$0xff]  ;;  %v1403_v2 = vld [vmem:[#allocation7 + $0x1f8] sm:$0xff] }
 0x132   : > { %1544 = vmatpush.msra.mxu0 %v1373_v37  ;;  %1582 = vmatpush.msra.mxu2 %v1475_v47  ;;  %v1466_v60 = vld [vmem:[#allocation7 + $0x3f0] sm:$0xff]  ;;  %v1463_v3 = vld [vmem:[#allocation7 + $0x3d8] sm:$0xff]  ;;  %v1428_v37 = vld [vmem:[#allocation7 + $0x2c0] sm:$0xff] }
 0x133   : > { %1564 = vmatpush.msra.mxu1 %v1421_v38  ;;  %v1346_v15 = vld [vmem:[#allocation7 + $0x30] sm:$0xff]  ;;  %v1343_v0 = vld [vmem:[#allocation7 + $0x18] sm:$0xff] }
 0x134   : > { %1545 = vmatpush.msra.mxu0 %v1370_v40  ;;  %1583 = vmatpush.msra.mxu2 %v1472_v50  ;;  %v1394_v63 = vld [vmem:[#allocation7 + $0x1b0] sm:$0xff]  ;;  %v1391_v19 = vld [vmem:[#allocation7 + $0x198] sm:$0xff]  ;;  %v1425_v40 = vld [vmem:[#allocation7 + $0x2a8] sm:$0xff] }
 0x135   : > { %1565 = vmatpush.msra.mxu1 %v1418_v41  ;;  %v1454_v17 = vld [vmem:[#allocation7 + $0x390] sm:$0xff]  ;;  %v1451_v21 = vld [vmem:[#allocation7 + $0x378] sm:$0xff] }
 0x136   : > { %1546 = vmatpush.msra.mxu0 %v1367_v44  ;;  %1584 = vmatpush.msra.mxu2 %v1469_v55  ;;  %v1434_v27 = vld [vmem:[#allocation7 + $0x2f0] sm:$0xff]  ;;  %v1431_v34 = vld [vmem:[#allocation7 + $0x2d8] sm:$0xff]  ;;  %v1476_v55 = vld [vmem:[#allocation7 + $0x440] sm:$0xff] }
 0x137   : > { %1566 = vmatpush.msra.mxu1 %v1415_v45  ;;  %v1386_v33 = vld [vmem:[#allocation7 + $0x170] sm:$0xff]  ;;  %v1383_v23 = vld [vmem:[#allocation7 + $0x158] sm:$0xff] }
 0x138   : > { %1547 = vmatpush.msra.mxu0 %v1364_v48  ;;  %1585 = vmatpush.msra.mxu2 %v1466_v60  ;;  %v1442_v42 = vld [vmem:[#allocation7 + $0x330] sm:$0xff]  ;;  %v1439_v45 = vld [vmem:[#allocation7 + $0x318] sm:$0xff]  ;;  %v1436_v48 = vld [vmem:[#allocation7 + $0x300] sm:$0xff] }
 0x139   : > { %1567 = vmatpush.msra.mxu1 %v1412_v49  ;;  %v1422_v44 = vld [vmem:[#allocation7 + $0x290] sm:$0xff]  ;;  %v1419_v47 = vld [vmem:[#allocation7 + $0x278] sm:$0xff] }
 0x13a   : > { %1548 = vmatpush.msra.mxu0 %v1361_v52  ;;  %1586 = vmatpush.msra.mxu2 %v1463_v3  ;;  %v1374_v46 = vld [vmem:[#allocation7 + $0x110] sm:$0xff]  ;;  %v1371_v50 = vld [vmem:[#allocation7 + $0xf8] sm:$0xff] }
 0x13b   : > { %1568 = vmatpush.msra.mxu1 %v1409_v53  ;;  %v1482_v49 = vld [vmem:[#allocation7 + $0x470] sm:$0xff]  ;;  %v1479_v52 = vld [vmem:[#allocation7 + $0x458] sm:$0xff]  ;;  %v1368_v53 = vld [vmem:[#allocation7 + $0xe0] sm:$0xff] }
 0x13c   : > { %1549 = vmatpush.msra.mxu0 %v1358_v56  ;;  %1587 = vmatpush.msra.mxu2 %v1460_v10  ;;  %v1365_v56 = vld [vmem:[#allocation7 + $0xc8] sm:$0xff]  ;;  %v1362_v60 = vld [vmem:[#allocation7 + $0xb0] sm:$0xff]  ;;  %v1407_v61 = vld [vmem:[#allocation7 + $0x218] sm:$0xff] }
 0x13d   : > { %1569 = vmatpush.msra.mxu1 %v1406_v57  ;;  %v993_v8 = vpop.f32.mrf.mxu2  ;;  %v1410_v57 = vld [vmem:[#allocation7 + $0x230] sm:$0xff]  ;;  %v1359_v3 = vld [vmem:[#allocation7 + $0x98] sm:$0xff]  ;;  %v1520_v10 = vld [vmem:[#allocation7 + $0x5a0] sm:$0xff] }
 0x13e   : > { %1550 = vmatpush.msra.mxu0 %v1355_v62  ;;  %v994_v9 = vadd.f32 %v993_v8, %v849_v59  ;;  %1588 = vmatpush.msra.mxu2 %v1457_v14  ;;  %v1473_v59 = vld [vmem:[#allocation7 + $0x428] sm:$0xff]  ;;  %v1526_v62 = vld [vmem:[#allocation7 + $0x5d0] sm:$0xff]  ;;  %v1356_v8 = vld [vmem:[#allocation7 + $0x80] sm:$0xff] }
 0x13f   : > { %1570 = vmatpush.msra.mxu1 %v1403_v2  ;;  %v1470_v2 = vld [vmem:[#allocation7 + $0x410] sm:$0xff]  ;;  %1601 = vmatpush.msra.mxu3 %v1526_v62  ;;  %v1461_v14 = vld [vmem:[#allocation7 + $0x3c8] sm:$0xff]  ;;  %v1411_v58 = vld [vmem:[#allocation7 + $0x238] sm:$0xff] }
 0x140   : > { %1551 = vmatpush.msra.mxu0 %v1352_v5  ;;  %v1013_v13 = vpop.f32.mrf.mxu3  ;;  %1589 = vmatpush.msra.mxu2 %v1454_v17  ;;  %v1523_v5 = vld [vmem:[#allocation7 + $0x5b8] sm:$0xff]  ;;  %v1408_v62 = vld [vmem:[#allocation7 + $0x220] sm:$0xff] }
 0x141   : > { %1571 = vmatpush.msra.mxu1 %v1400_v6  ;;  %v1014_v7 = vadd.f32 %v1013_v13, %v994_v9  ;;  %v1467_v6 = vld [vmem:[#allocation7 + $0x3f8] sm:$0xff]  ;;  %1602 = vmatpush.msra.mxu3 %v1523_v5  ;;  %v1401_v9 = vld [vmem:[#allocation7 + $0x1e8] sm:$0xff] }
 0x142   : > { %1552 = vmatpush.msra.mxu0 %v1349_v12  ;;  %v1033_v16 = vpop.f32.mrf.mxu0  ;;  %1590 = vmatpush.msra.mxu2 %v1451_v21  ;;  %v1353_v12 = vld [vmem:[#allocation7 + $0x68] sm:$0xff]  ;;  %v1347_v17 = vld [vmem:[#allocation7 + $0x38] sm:$0xff] }
 0x143   : > { %1572 = vmatpush.msra.mxu1 %v1397_v1  ;;  %v1034_v20 = vadd.f32 %v1033_v16, %v1014_v7  ;;  %1603 = vmatpush.msra.mxu3 %v1520_v10  ;;  %v1398_v1 = vld [vmem:[#allocation7 + $0x1d0] sm:$0xff]  ;;  %v1517_v13 = vld [vmem:[#allocation7 + $0x588] sm:$0xff] }
 0x144   : > { %1553 = vmatpush.msra.mxu0 %v1346_v15  ;;  %1591 = vmatpush.msra.mxu2 %v1448_v31  ;;  %v1350_v15 = vld [vmem:[#allocation7 + $0x50] sm:$0xff]  ;;  %v1389_v21 = vld [vmem:[#allocation7 + $0x188] sm:$0xff] }
 0x145   : > { %1573 = vmatpush.msra.mxu1 %v1394_v63  ;;  %v1053_v26 = vpop.f32.mrf.mxu1  ;;  %1604 = vmatpush.msra.mxu3 %v1517_v13  ;;  %v1395_v63 = vld [vmem:[#allocation7 + $0x1b8] sm:$0xff]  ;;  %v1514_v7 = vld [vmem:[#allocation7 + $0x570] sm:$0xff]  ;;  %v1449_v31 = vld [vmem:[#allocation7 + $0x368] sm:$0xff] }
 0x146   : > { %1554 = vmatpush.msra.mxu0 %v1343_v0  ;;  %v1054_v29 = vadd.f32 %v1053_v26, %v1034_v20  ;;  %v1073_v30 = vpop.f32.mrf.mxu2  ;;  %1592 = vmatpush.msra.mxu2 %v1445_v39  ;;  %v1458_v16 = vld [vmem:[#allocation7 + $0x3b0] sm:$0xff]  ;;  %v1511_v0 = vld [vmem:[#allocation7 + $0x558] sm:$0xff]  ;;  %v1344_v20 = vld [vmem:[#allocation7 + $0x20] sm:$0xff] }
 0x147   : > { %1574 = vmatpush.msra.mxu1 %v1391_v19  ;;  %1605 = vmatpush.msra.mxu3 %v1514_v7  ;;  %v1455_v19 = vld [vmem:[#allocation7 + $0x398] sm:$0xff]  ;;  %v1341_v26 = vld [vmem:[#allocation7 + $0x8] sm:$0xff]  ;;  %v1402_v10 = vld [vmem:[#allocation7 + $0x1f0] sm:$0xff] }
 0x148   : > { %1555 = vmatpush.msra.mxu0 %v1340_v22  ;;  %v1074_v35 = vadd.f32 %v1073_v30, %v1054_v29  ;;  %1593 = vmatpush.msra.mxu2 %v1442_v42  ;;  %v1508_v22 = vld [vmem:[#allocation7 + $0x540] sm:$0xff]  ;;  %v1505_v29 = vld [vmem:[#allocation7 + $0x528] sm:$0xff]  ;;  %v1387_v30 = vld [vmem:[#allocation7 + $0x178] sm:$0xff] }
 0x149   : > { %1575 = vmatpush.msra.mxu1 %v1388_v24  ;;  %1556 = vmatmul.f32.vlgmr.msra.gmra.mxu0 %v2843_v32  ;;  %v1093_v36 = vpop.f32.mrf.mxu3  ;;  %v1452_v24 = vld [vmem:[#allocation7 + $0x380] sm:$0xff]  ;;  %v1443_v39 = vld [vmem:[#allocation7 + $0x338] sm:$0xff]  ;;  %v1378_v42 = vld [vmem:[#allocation7 + $0x130] sm:$0xff] }
 0x14a   : > { %1620 = vmatpush.msrb.mxu0 %v1386_v33  ;;  %v1094_v38 = vadd.f32 %v1093_v36, %v1074_v35  ;;  %1594 = vmatpush.msra.mxu2 %v1439_v45  ;;  %v1432_v33 = vld [vmem:[#allocation7 + $0x2e0] sm:$0xff]  ;;  %v1502_v35 = vld [vmem:[#allocation7 + $0x510] sm:$0xff]  ;;  %v1429_v36 = vld [vmem:[#allocation7 + $0x2c8] sm:$0xff] }
 0x14b   : > { %1640 = vmatpush.msrb.mxu1 %v1434_v27  ;;  %1606 = vmatpush.msra.mxu3 %v1511_v0  ;;  %v1435_v27 = vld [vmem:[#allocation7 + $0x2f8] sm:$0xff]  ;;  %v1493_v45 = vld [vmem:[#allocation7 + $0x4c8] sm:$0xff] }
 0x14c   : > { %1621 = vmatpush.msrb.mxu0 %v1383_v23  ;;  %v2846_v41 = vmax.f32 %v1094_v38, 0.0  ;;  %1595 = vmatpush.msra.mxu2 %v1436_v48  ;;  %v1446_v23 = vld [vmem:[#allocation7 + $0x350] sm:$0xff]  ;;  %v1381_v38 = vld [vmem:[#allocation7 + $0x148] sm:$0xff]  ;;  %v1420_v48 = vld [vmem:[#allocation7 + $0x280] sm:$0xff] }
 0x14d   : > { %1641 = vmatpush.msrb.mxu1 %v1431_v34  ;;  %1607 = vmatpush.msra.mxu3 %v1508_v22  ;;  %v1384_v34 = vld [vmem:[#allocation7 + $0x160] sm:$0xff]  ;;  %v1399_v13 = vld [vmem:[#allocation7 + $0x1d8] sm:$0xff]  ;;  %v1345_v22 = vld [vmem:[#allocation7 + $0x28] sm:$0xff] }
 0x14e   : > { %1622 = vmatpush.msrb.mxu0 %v1380_v28  ;;  %1576 = vmatmul.f32.vlgmr.msra.gmra.mxu1 %v2846_v41  ;;  %v1426_v28 = vld [vmem:[#allocation7 + $0x2b0] sm:$0xff]  ;;  %v1515_v7 = vld [vmem:[#allocation7 + $0x578] sm:$0xff] }
 0x14f   : > { %1642 = vmatpush.msrb.mxu1 %v1428_v37  ;;  %1660 = vmatpush.msrb.mxu2 %v1482_v49  ;;  %v1499_v37 = vld [vmem:[#allocation7 + $0x4f8] sm:$0xff]  ;;  %v1490_v49 = vld [vmem:[#allocation7 + $0x4b0] sm:$0xff] }
 0x150   : > { %1623 = vmatpush.msrb.mxu0 %v1377_v43  ;;  %1608 = vmatpush.msra.mxu3 %v1505_v29  ;;  %v1440_v43 = vld [vmem:[#allocation7 + $0x320] sm:$0xff]  ;;  %v1342_v29 = vld [vmem:[#allocation7 + $0x10] sm:$0xff] }
 0x151   : > { %1643 = vmatpush.msrb.mxu1 %v1425_v40  ;;  %1661 = vmatpush.msrb.mxu2 %v1479_v52  ;;  %v1496_v40 = vld [vmem:[#allocation7 + $0x4e0] sm:$0xff]  ;;  %v1487_v52 = vld [vmem:[#allocation7 + $0x498] sm:$0xff] }
 0x152   : > { %1624 = vmatpush.msrb.mxu0 %v1374_v46  ;;  %1609 = vmatpush.msra.mxu3 %v1502_v35  ;;  %v1375_v46 = vld [vmem:[#allocation7 + $0x118] sm:$0xff] }
 0x153   : > { %1644 = vmatpush.msrb.mxu1 %v1422_v44  ;;  %1662 = vmatpush.msrb.mxu2 %v1476_v55  ;;  %v1423_v44 = vld [vmem:[#allocation7 + $0x298] sm:$0xff]  ;;  %v1484_v55 = vld [vmem:[#allocation7 + $0x480] sm:$0xff] }
 0x154   : > { %1625 = vmatpush.msrb.mxu0 %v1371_v50  ;;  %1610 = vmatpush.msra.mxu3 %v1499_v37  ;;  %v1372_v50 = vld [vmem:[#allocation7 + $0x100] sm:$0xff]  ;;  %v1503_v35 = vld [vmem:[#allocation7 + $0x518] sm:$0xff] }
 0x155   : > { %1645 = vmatpush.msrb.mxu1 %v1419_v47  ;;  %1663 = vmatpush.msrb.mxu2 %v1473_v59  ;;  %v1437_v47 = vld [vmem:[#allocation7 + $0x308] sm:$0xff]  ;;  %v1363_v59 = vld [vmem:[#allocation7 + $0xb8] sm:$0xff]  ;;  %v1500_v37 = vld [vmem:[#allocation7 + $0x500] sm:$0xff] }
 0x156   : > { %1626 = vmatpush.msrb.mxu0 %v1368_v53  ;;  %1611 = vmatpush.msra.mxu3 %v1496_v40  ;;  %v1369_v53 = vld [vmem:[#allocation7 + $0xe8] sm:$0xff]  ;;  %v1494_v40 = vld [vmem:[#allocation7 + $0x4d0] sm:$0xff] }
 0x157   : > { %1646 = vmatpush.msrb.mxu1 %v1416_v51  ;;  %1664 = vmatpush.msrb.mxu2 %v1470_v2  ;;  %v1417_v51 = vld [vmem:[#allocation7 + $0x268] sm:$0xff]  ;;  %v1360_v2 = vld [vmem:[#allocation7 + $0xa0] sm:$0xff] }
 0x158   : > { %1627 = vmatpush.msrb.mxu0 %v1365_v56  ;;  %1612 = vmatpush.msra.mxu3 %v1493_v45  ;;  %v1366_v56 = vld [vmem:[#allocation7 + $0xd0] sm:$0xff]  ;;  %v1485_v45 = vld [vmem:[#allocation7 + $0x488] sm:$0xff] }
 0x159   : > { %1647 = vmatpush.msrb.mxu1 %v1413_v54  ;;  %1665 = vmatpush.msrb.mxu2 %v1467_v6  ;;  %v1414_v54 = vld [vmem:[#allocation7 + $0x250] sm:$0xff]  ;;  %v1357_v6 = vld [vmem:[#allocation7 + $0x88] sm:$0xff] }
 0x15a   : > { %1628 = vmatpush.msrb.mxu0 %v1362_v60  ;;  %1613 = vmatpush.msra.mxu3 %v1490_v49  ;;  %v850_v60 = vperm.slane %v2835_v25, 2  ;;  %v1456_v49 = vld [vmem:[#allocation7 + $0x3a0] sm:$0xff] }
 0x15b   : > { %1648 = vmatpush.msrb.mxu1 %v1410_v57  ;;  %1666 = vmatpush.msrb.mxu2 %v1464_v11  ;;  %v1530_v57 = vld [vmem:[#allocation7 + $0x5f0] sm:$0xff] }
 0x15c   : > { %1629 = vmatpush.msrb.mxu0 %v1359_v3  ;;  %1614 = vmatpush.msra.mxu3 %v1487_v52  ;;  %v1524_v3 = vld [vmem:[#allocation7 + $0x5c0] sm:$0xff]  ;;  %v1354_v11 = vld [vmem:[#allocation7 + $0x70] sm:$0xff]  ;;  %v851_v52 = vperm.slane %v2835_v25, 3 }
 0x15d   : > { %1649 = vmatpush.msrb.mxu1 %v1407_v61  ;;  %1667 = vmatpush.msrb.mxu2 %v1461_v14  ;;  %v1527_v61 = vld [vmem:[#allocation7 + $0x5d8] sm:$0xff] }
 0x15e   : > { %1630 = vmatpush.msrb.mxu0 %v1356_v8  ;;  %1615 = vmatpush.msra.mxu3 %v1484_v55  ;;  %v1444_v55 = vld [vmem:[#allocation7 + $0x340] sm:$0xff] }
 0x15f   : > { %1650 = vmatpush.msrb.mxu1 %v1404_v4  ;;  %1668 = vmatpush.msrb.mxu2 %v1458_v16  ;;  %v1405_v4 = vld [vmem:[#allocation7 + $0x208] sm:$0xff]  ;;  %v1396_v16 = vld [vmem:[#allocation7 + $0x1c0] sm:$0xff] }
 0x160   : > { %1631 = vmatpush.msrb.mxu0 %v1353_v12  ;;  %1680 = vmatpush.msrb.mxu3 %v1530_v57  ;;  %v1441_v57 = vld [vmem:[#allocation7 + $0x328] sm:$0xff] }
 0x161   : > { %1651 = vmatpush.msrb.mxu1 %v1401_v9  ;;  %1669 = vmatpush.msrb.mxu2 %v1455_v19  ;;  %v1521_v9 = vld [vmem:[#allocation7 + $0x5a8] sm:$0xff]  ;;  %v1512_v19 = vld [vmem:[#allocation7 + $0x560] sm:$0xff] }
 0x162   : > { %1632 = vmatpush.msrb.mxu0 %v1350_v15  ;;  %1681 = vmatpush.msrb.mxu3 %v1527_v61 }
 0x163   : > { %1652 = vmatpush.msrb.mxu1 %v1398_v1  ;;  %1670 = vmatpush.msrb.mxu2 %v1452_v24  ;;  %v1518_v1 = vld [vmem:[#allocation7 + $0x590] sm:$0xff]  ;;  %v1509_v24 = vld [vmem:[#allocation7 + $0x548] sm:$0xff] }
 0x164   : > { %1633 = vmatpush.msrb.mxu0 %v1347_v17  ;;  %1682 = vmatpush.msrb.mxu3 %v1524_v3 }
 0x165   : > { %1653 = vmatpush.msrb.mxu1 %v1395_v63  ;;  %1671 = vmatpush.msrb.mxu2 %v1449_v31  ;;  %v1351_v63 = vld [vmem:[#allocation7 + $0x58] sm:$0xff] }
 0x166   : > { %1634 = vmatpush.msrb.mxu0 %v1344_v20  ;;  %1683 = vmatpush.msrb.mxu3 %v1521_v9  ;;  %v1393_v20 = vld [vmem:[#allocation7 + $0x1a8] sm:$0xff]  ;;  %v1531_v9 = vld [vmem:[#allocation7 + $0x5f8] sm:$0xff] }
 0x167   : > { %1654 = vmatpush.msrb.mxu1 %v1392_v18  ;;  %1672 = vmatpush.msrb.mxu2 %v1446_v23  ;;  %v1348_v18 = vld [vmem:[#allocation7 + $0x40] sm:$0xff] }
 0x168   : > { %1635 = vmatpush.msrb.mxu0 %v1341_v26  ;;  %1684 = vmatpush.msrb.mxu3 %v1518_v1  ;;  %v1390_v26 = vld [vmem:[#allocation7 + $0x190] sm:$0xff]  ;;  %v1519_v1 = vld [vmem:[#allocation7 + $0x598] sm:$0xff] }
 0x169   : > { %1655 = vmatpush.msrb.mxu1 %v1389_v21  ;;  %1636 = vmatmul.f32.vlgmr.msrb.gmra.mxu0 %v2843_v32 }
 0x16a   : > { %1656 = vmatmul.f32.vlgmr.msrb.gmra.mxu1 %v2846_v41  ;;  %1700 = vmatpush.msra.mxu0 %v1387_v30 }
 0x16b   : > { %1720 = vmatpush.msra.mxu1 %v1435_v27  ;;  %1673 = vmatpush.msrb.mxu2 %v1443_v39  ;;  %v1497_v39 = vld [vmem:[#allocation7 + $0x4e8] sm:$0xff] }
 0x16c   : > { %1701 = vmatpush.msra.mxu0 %v1384_v34  ;;  %1685 = vmatpush.msrb.mxu3 %v1515_v7  ;;  %v1504_v7 = vld [vmem:[#allocation7 + $0x520] sm:$0xff] }
 0x16d   : > { %1721 = vmatpush.msra.mxu1 %v1432_v33  ;;  %1674 = vmatpush.msrb.mxu2 %v1440_v43  ;;  %v1506_v33 = vld [vmem:[#allocation7 + $0x530] sm:$0xff]  ;;  %v1471_v43 = vld [vmem:[#allocation7 + $0x418] sm:$0xff] }
 0x16e   : > { %1702 = vmatpush.msra.mxu0 %v1381_v38  ;;  %1686 = vmatpush.msrb.mxu3 %v1512_v19  ;;  %v1480_v38 = vld [vmem:[#allocation7 + $0x460] sm:$0xff]  ;;  %v1489_v19 = vld [vmem:[#allocation7 + $0x4a8] sm:$0xff] }
 0x16f   : > { %1722 = vmatpush.msra.mxu1 %v1429_v36  ;;  %1675 = vmatpush.msrb.mxu2 %v1437_v47  ;;  %v1483_v36 = vld [vmem:[#allocation7 + $0x478] sm:$0xff]  ;;  %v1462_v47 = vld [vmem:[#allocation7 + $0x3d0] sm:$0xff] }
 0x170   : > { %1703 = vmatpush.msra.mxu0 %v1378_v42  ;;  %1687 = vmatpush.msrb.mxu3 %v1509_v24  ;;  %v1474_v42 = vld [vmem:[#allocation7 + $0x430] sm:$0xff]  ;;  %v1814_v24 = vld [vmem:[#allocation10 + $0xf8] sm:$0xff] }
 0x171   : > { %1723 = vmatpush.msra.mxu1 %v1426_v28  ;;  %v1477_v28 = vld [vmem:[#allocation7 + $0x448] sm:$0xff] }
 0x172   : > { %1704 = vmatpush.msra.mxu0 %v1375_v46  ;;  %1688 = vmatpush.msrb.mxu3 %v1506_v33  ;;  %v1465_v46 = vld [vmem:[#allocation7 + $0x3e8] sm:$0xff]  ;;  %v1794_v33 = vld [vmem:[#allocation10 + $0x58] sm:$0xff] }
 0x173   : > { %1724 = vmatpush.msra.mxu1 %v1423_v44  ;;  %v1468_v44 = vld [vmem:[#allocation7 + $0x400] sm:$0xff] }
 0x174   : > { %1705 = vmatpush.msra.mxu0 %v1372_v50  ;;  %1689 = vmatpush.msrb.mxu3 %v1503_v35  ;;  %v1453_v50 = vld [vmem:[#allocation7 + $0x388] sm:$0xff]  ;;  %v1793_v35 = vld [vmem:[#allocation10 + $0x50] sm:$0xff] }
 0x175   : > { %1725 = vmatpush.msra.mxu1 %v1420_v48  ;;  %v1459_v48 = vld [vmem:[#allocation7 + $0x3b8] sm:$0xff] }
 0x176   : > { %1706 = vmatpush.msra.mxu0 %v1369_v53  ;;  %1690 = vmatpush.msrb.mxu3 %v1500_v37  ;;  %v1447_v53 = vld [vmem:[#allocation7 + $0x358] sm:$0xff]  ;;  %v1791_v37 = vld [vmem:[#allocation10 + $0x40] sm:$0xff] }
 0x177   : > { %1726 = vmatpush.msra.mxu1 %v1417_v51  ;;  %v1450_v51 = vld [vmem:[#allocation7 + $0x370] sm:$0xff] }
 0x178   : > { %1707 = vmatpush.msra.mxu0 %v1366_v56  ;;  %1691 = vmatpush.msrb.mxu3 %v1497_v39  ;;  %v1789_v39 = vld [vmem:[#allocation10 + $0x30] sm:$0xff] }
 0x179   : > { %1727 = vmatpush.msra.mxu1 %v1414_v54 }
 0x17a   : > { %1708 = vmatpush.msra.mxu0 %v1363_v59  ;;  %v1113_v5 = vpop.f32.mrf.mxu0  ;;  %1692 = vmatpush.msrb.mxu3 %v1494_v40  ;;  %v1808_v40 = vld [vmem:[#allocation10 + $0xc8] sm:$0xff] }
 0x17b   : > { %1728 = vmatpush.msra.mxu1 %v1411_v58  ;;  %v1114_v8 = vadd.f32 %v1113_v5, %v850_v60  ;;  %v1438_v60 = vld [vmem:[#allocation7 + $0x310] sm:$0xff] }
 0x17c   : > { %1709 = vmatpush.msra.mxu0 %v1360_v2 }
 0x17d   : > { %1729 = vmatpush.msra.mxu1 %v1408_v62  ;;  %v1133_v12 = vpop.f32.mrf.mxu1 }
 0x17e   : > { %1710 = vmatpush.msra.mxu0 %v1357_v6  ;;  %v1134_v14 = vadd.f32 %v1133_v12, %v1114_v8  ;;  %v1153_v15 = vpop.f32.mrf.mxu2  ;;  %v1522_v12 = vld [vmem:[#allocation7 + $0x5b0] sm:$0xff] }
 0x17f   : > { %1730 = vmatpush.msra.mxu1 %v1405_v4 }
 0x180   : > { %1711 = vmatpush.msra.mxu0 %v1354_v11  ;;  %v1154_v17 = vadd.f32 %v1153_v15, %v1134_v14  ;;  %v1525_v11 = vld [vmem:[#allocation7 + $0x5c8] sm:$0xff]  ;;  %v1510_v15 = vld [vmem:[#allocation7 + $0x550] sm:$0xff] }
 0x181   : > { %1731 = vmatpush.msra.mxu1 %v1402_v10  ;;  %v1173_v0 = vpop.f32.mrf.mxu3  ;;  %v1528_v10 = vld [vmem:[#allocation7 + $0x5e0] sm:$0xff]  ;;  %v1513_v14 = vld [vmem:[#allocation7 + $0x568] sm:$0xff] }
 0x182   : > { %1712 = vmatpush.msra.mxu0 %v1351_v63  ;;  %v1174_v21 = vadd.f32 %v1173_v0, %v1154_v17  ;;  %v1507_v63 = vld [vmem:[#allocation7 + $0x538] sm:$0xff]  ;;  %v1498_v17 = vld [vmem:[#allocation7 + $0x4f0] sm:$0xff]  ;;  %v1492_v0 = vld [vmem:[#allocation7 + $0x4c0] sm:$0xff] }
 0x183   : > { %1732 = vmatpush.msra.mxu1 %v1399_v13  ;;  %v1516_v13 = vld [vmem:[#allocation7 + $0x580] sm:$0xff] }
 0x184   : > { %1713 = vmatpush.msra.mxu0 %v1348_v18  ;;  %v1193_v27 = vpop.f32.mrf.mxu0  ;;  %v1495_v18 = vld [vmem:[#allocation7 + $0x4d8] sm:$0xff] }
 0x185   : > { %1733 = vmatpush.msra.mxu1 %v1396_v16  ;;  %v1194_v30 = vadd.f32 %v1193_v27, %v1174_v21  ;;  %v1501_v16 = vld [vmem:[#allocation7 + $0x508] sm:$0xff]  ;;  %v1798_v21 = vld [vmem:[#allocation10 + $0x78] sm:$0xff]  ;;  %v1813_v27 = vld [vmem:[#allocation10 + $0xf0] sm:$0xff] }
 0x186   : > { %1714 = vmatpush.msra.mxu0 %v1345_v22  ;;  %v1213_v31 = vpop.f32.mrf.mxu1  ;;  %v1797_v22 = vld [vmem:[#allocation10 + $0x70] sm:$0xff] }
 0x187   : > { %1734 = vmatpush.msra.mxu1 %v1393_v20  ;;  %v1214_v34 = vadd.f32 %v1213_v31, %v1194_v30  ;;  %v1486_v20 = vld [vmem:[#allocation7 + $0x490] sm:$0xff]  ;;  %v1795_v30 = vld [vmem:[#allocation10 + $0x60] sm:$0xff] }
 0x188   : > { %1715 = vmatpush.msra.mxu0 %v1342_v29  ;;  %v1812_v29 = vld [vmem:[#allocation10 + $0xe8] sm:$0xff]  ;;  %v1811_v31 = vld [vmem:[#allocation10 + $0xe0] sm:$0xff] }
 0x189   : > { %1735 = vmatpush.msra.mxu1 %v1390_v26  ;;  %1716 = vmatmul.f32.vlgmr.msra.gmra.mxu0 %v2843_v32  ;;  %v1338_v23 = vmax.f32 %v1214_v34, 0.0  ;;  %v1488_v32 = vld [vmem:[#allocation7 + $0x4a0] sm:$0xff]  ;;  %v1796_v26 = vld [vmem:[#allocation10 + $0x68] sm:$0xff] }
 0x18a   : > { %1736 = vmatmul.f32.vlgmr.msra.gmra.mxu1 %v2846_v41  ;;  %v1491_v41 = vld [vmem:[#allocation7 + $0x4b8] sm:$0xff]  ;;  %1835 = vmatpush.msrb.mxu0 %v1798_v21 }
 0x18b   : > { %1596 = vmatmul.f32.vlgmr.msra.gmra.mxu2 %v1338_v23  ;;  %1693 = vmatpush.msrb.mxu3 %v1491_v41  ;;  %v1810_v34 = vld [vmem:[#allocation10 + $0xd8] sm:$0xff]  ;;  %v1807_v41 = vld [vmem:[#allocation10 + $0xc0] sm:$0xff] }
 0x18c   : > { %1740 = vmatpush.msra.mxu2 %v1483_v36  ;;  %1855 = vmatpush.msrb.mxu1 %v1814_v24  ;;  %v1792_v36 = vld [vmem:[#allocation10 + $0x48] sm:$0xff] }
 0x18d   : > { %1694 = vmatpush.msrb.mxu3 %v1488_v32  ;;  %1836 = vmatpush.msrb.mxu0 %v1797_v22  ;;  %v1806_v32 = vld [vmem:[#allocation10 + $0xb8] sm:$0xff] }
 0x18e   : > { %1741 = vmatpush.msra.mxu2 %v1480_v38  ;;  %1856 = vmatpush.msrb.mxu1 %v1813_v27  ;;  %v1790_v38 = vld [vmem:[#allocation10 + $0x38] sm:$0xff] }
 0x18f   : > { %1695 = vmatpush.msrb.mxu3 %v1485_v45  ;;  %1837 = vmatpush.msrb.mxu0 %v1796_v26  ;;  %v1805_v45 = vld [vmem:[#allocation10 + $0xb0] sm:$0xff] }
 0x190   : > { %1742 = vmatpush.msra.mxu2 %v1477_v28  ;;  %1857 = vmatpush.msrb.mxu1 %v1812_v29  ;;  %v1788_v28 = vld [vmem:[#allocation10 + $0x28] sm:$0xff] }
 0x191   : > { %1838 = vmatpush.msrb.mxu0 %v1795_v30 }
 0x192   : > { %1743 = vmatpush.msra.mxu2 %v1474_v42  ;;  %1858 = vmatpush.msrb.mxu1 %v1811_v31  ;;  %v1787_v42 = vld [vmem:[#allocation10 + $0x20] sm:$0xff] }
 0x193   : > { %1676 = vmatmul.f32.vlgmr.msrb.gmra.mxu2 %v1338_v23  ;;  %1839 = vmatpush.msrb.mxu0 %v1794_v33 }
 0x194   : > { %1744 = vmatpush.msra.mxu2 %v1471_v43  ;;  %1859 = vmatpush.msrb.mxu1 %v1810_v34  ;;  %v1786_v43 = vld [vmem:[#allocation10 + $0x18] sm:$0xff] }
 0x195   : > { %1840 = vmatpush.msrb.mxu0 %v1793_v35 }
 0x196   : > { %1745 = vmatpush.msra.mxu2 %v1468_v44  ;;  %v1785_v44 = vld [vmem:[#allocation10 + $0x10] sm:$0xff] }
 0x197   : > { %1841 = vmatpush.msrb.mxu0 %v1792_v36 }
 0x198   : > { %1746 = vmatpush.msra.mxu2 %v1465_v46  ;;  %v1784_v46 = vld [vmem:[#allocation10 + $0x8] sm:$0xff] }
 0x199   : > { %1842 = vmatpush.msrb.mxu0 %v1791_v37 }
 0x19a   : > { %1747 = vmatpush.msra.mxu2 %v1462_v47  ;;  %v1804_v47 = vld [vmem:[#allocation10 + $0xa8] sm:$0xff] }
 0x19b   : > { %1843 = vmatpush.msrb.mxu0 %v1790_v38 }
 0x19c   : > { %1748 = vmatpush.msra.mxu2 %v1459_v48  ;;  %v1783_v48 = vld [vmem:[#allocation10] sm:$0xff] }
 0x19d   : > { %1844 = vmatpush.msrb.mxu0 %v1789_v39  ;;  %v1911_v39 = vld [vmem:[#allocation13 + $0x78] sm:$0xff] }
 0x19e   : > { %1749 = vmatpush.msra.mxu2 %v1456_v49  ;;  %v1803_v49 = vld [vmem:[#allocation10 + $0xa0] sm:$0xff] }
 0x19f   : > { %1845 = vmatpush.msrb.mxu0 %v1788_v28  ;;  %v1910_v28 = vld [vmem:[#allocation13 + $0x70] sm:$0xff] }
 0x1a0   : > { %1750 = vmatpush.msra.mxu2 %v1453_v50  ;;  %v1830_v50 = vld [vmem:[#allocation10 + $0x178] sm:$0xff] }
 0x1a1   : > { %1846 = vmatpush.msrb.mxu0 %v1787_v42  ;;  %v1908_v42 = vld [vmem:[#allocation13 + $0x60] sm:$0xff] }
 0x1a2   : > { %1751 = vmatpush.msra.mxu2 %v1450_v51  ;;  %v1829_v51 = vld [vmem:[#allocation10 + $0x170] sm:$0xff] }
 0x1a3   : > { %v1233_v54 = vpop.f32.mrf.mxu2  ;;  %1847 = vmatpush.msrb.mxu0 %v1786_v43  ;;  %v1906_v43 = vld [vmem:[#allocation13 + $0x50] sm:$0xff] }
 0x1a4   : > { %v1234_v56 = vadd.f32 %v1233_v54, %v851_v52  ;;  %1752 = vmatpush.msra.mxu2 %v1447_v53  ;;  %v1802_v52 = vld [vmem:[#allocation10 + $0x98] sm:$0xff]  ;;  %v1801_v53 = vld [vmem:[#allocation10 + $0x90] sm:$0xff]  ;;  %v1828_v54 = vld [vmem:[#allocation10 + $0x168] sm:$0xff] }
 0x1a5   : > { %v1273_v61 = vpop.f32.mrf.mxu0  ;;  %1848 = vmatpush.msrb.mxu0 %v1785_v44  ;;  %v1904_v44 = vld [vmem:[#allocation13 + $0x40] sm:$0xff] }
 0x1a6   : > { %v1253_v58 = vpop.f32.mrf.mxu3  ;;  %1753 = vmatpush.msra.mxu2 %v1444_v55  ;;  %v1800_v55 = vld [vmem:[#allocation10 + $0x88] sm:$0xff] }
 0x1a7   : > { %v1254_v59 = vadd.f32 %v1253_v58, %v1234_v56  ;;  %1849 = vmatpush.msrb.mxu0 %v1784_v46  ;;  %v1827_v56 = vld [vmem:[#allocation10 + $0x160] sm:$0xff]  ;;  %v1826_v58 = vld [vmem:[#allocation10 + $0x158] sm:$0xff] }
 0x1a8   : > { %1754 = vmatpush.msra.mxu2 %v1441_v57  ;;  %v1799_v57 = vld [vmem:[#allocation10 + $0x80] sm:$0xff]  ;;  %v1902_v46 = vld [vmem:[#allocation13 + $0x30] sm:$0xff] }
 0x1a9   : > { %v1274_v62 = vadd.f32 %v1273_v61, %v1254_v59  ;;  %1850 = vmatpush.msrb.mxu0 %v1783_v48  ;;  %v1825_v59 = vld [vmem:[#allocation10 + $0x150] sm:$0xff]  ;;  %v1823_v61 = vld [vmem:[#allocation10 + $0x140] sm:$0xff] }
 0x1aa   : > { %1755 = vmatpush.msra.mxu2 %v1438_v60  ;;  %v1824_v60 = vld [vmem:[#allocation10 + $0x148] sm:$0xff] }
 0x1ab   : > { %v1293_v2 = vpop.f32.mrf.mxu1  ;;  %1756 = vmatmul.f32.vlgmr.msra.gmra.mxu2 %v1338_v23  ;;  %v1809_v23 = vld [vmem:[#allocation10 + $0xd0] sm:$0xff]  ;;  %v1900_v48 = vld [vmem:[#allocation13 + $0x20] sm:$0xff] }
 0x1ac   : > { %v1294_v3 = vadd.f32 %v1293_v2, %v1274_v62  ;;  %v1313_v4 = vpop.f32.mrf.mxu2  ;;  %1860 = vmatpush.msrb.mxu1 %v1809_v23  ;;  %1875 = vmatpush.msrb.mxu2 %v1830_v50  ;;  %v1532_v62 = vld [vmem:[#allocation8] sm:$0x7]  ;;  %v1898_v50 = vld [vmem:[#allocation13 + $0x10] sm:$0xff] }
 0x1ad   : > { %v1822_v2 = vld [vmem:[#allocation10 + $0x138] sm:$0xff]  ;;  %v1536_v29 = vperm.slane %v1532_v62, 2 }
 0x1ae   : > { %v1314_v25 = vadd.f32 %v1313_v4, %v1294_v3  ;;  %1861 = vmatpush.msrb.mxu1 %v1808_v40  ;;  %1876 = vmatpush.msrb.mxu2 %v1829_v51  ;;  %v1534_v4 = vperm.slane %v1532_v62, 0  ;;  %v1909_v40 = vld [vmem:[#allocation13 + $0x68] sm:$0xff] }
 0x1af   : > { %v1333_v5 = vpop.f32.mrf.mxu3  ;;  %v1897_v51 = vld [vmem:[#allocation13 + $0x8] sm:$0xff] }
 0x1b0   : > { %v1334_v6 = vadd.f32 %v1333_v5, %v1314_v25  ;;  %1862 = vmatpush.msrb.mxu1 %v1807_v41  ;;  %1877 = vmatpush.msrb.mxu2 %v1828_v54  ;;  %v1821_v25 = vld [vmem:[#allocation10 + $0x130] sm:$0xff]  ;;  %v1820_v5 = vld [vmem:[#allocation10 + $0x128] sm:$0xff]  ;;  %v1907_v41 = vld [vmem:[#allocation13 + $0x58] sm:$0xff] }
 0x1b2   : > { %v1339_v8 = vmax.f32 %v1334_v6, 0.0  ;;  %1863 = vmatpush.msrb.mxu1 %v1806_v32  ;;  %1878 = vmatpush.msrb.mxu2 %v1827_v56  ;;  %v1905_v32 = vld [vmem:[#allocation13 + $0x48] sm:$0xff] }
 0x1b4   : > { %1616 = vmatmul.f32.vlgmr.msra.gmra.mxu3 %v1339_v8  ;;  %1864 = vmatpush.msrb.mxu1 %v1805_v45  ;;  %v1903_v45 = vld [vmem:[#allocation13 + $0x38] sm:$0xff] }
 0x1b5   : > { %1760 = vmatpush.msra.mxu3 %v1531_v9  ;;  %1879 = vmatpush.msrb.mxu2 %v1826_v58 }
 0x1b6   : > { %1865 = vmatpush.msrb.mxu1 %v1804_v47  ;;  %v1901_v47 = vld [vmem:[#allocation13 + $0x28] sm:$0xff] }
 0x1b7   : > { %1761 = vmatpush.msra.mxu3 %v1528_v10  ;;  %1880 = vmatpush.msrb.mxu2 %v1825_v59  ;;  %v1819_v10 = vld [vmem:[#allocation10 + $0x120] sm:$0xff] }
 0x1b8   : > { %1866 = vmatpush.msrb.mxu1 %v1803_v49  ;;  %v1899_v49 = vld [vmem:[#allocation13 + $0x18] sm:$0xff] }
 0x1b9   : > { %1762 = vmatpush.msra.mxu3 %v1525_v11  ;;  %1881 = vmatpush.msrb.mxu2 %v1824_v60 }
 0x1ba   : > { %1867 = vmatpush.msrb.mxu1 %v1802_v52  ;;  %v1896_v52 = vld [vmem:[#allocation13] sm:$0xff] }
 0x1bb   : > { %1763 = vmatpush.msra.mxu3 %v1522_v12  ;;  %1882 = vmatpush.msrb.mxu2 %v1823_v61  ;;  %v1535_v12 = vperm.slane %v1532_v62, 1  ;;  %v2265_v61 = vld [vmem:[#allocation14] ss:$0 sm:$0xff] }
 0x1bc   : > { %1696 = vmatmul.f32.vlgmr.msrb.gmra.mxu3 %v1339_v8  ;;  %1868 = vmatpush.msrb.mxu1 %v1801_v53  ;;  %v2264_v53 = vld [vmem:[#allocation11] ss:$0 sm:$0xff] }
 0x1bd   : > { %1764 = vmatpush.msra.mxu3 %v1519_v1  ;;  %1883 = vmatpush.msrb.mxu2 %v1822_v2  ;;  %v1818_v1 = vld [vmem:[#allocation10 + $0x118] sm:$0xff] }
 0x1be   : > { %1869 = vmatpush.msrb.mxu1 %v1800_v55 }
 0x1bf   : > { %1765 = vmatpush.msra.mxu3 %v1516_v13  ;;  %1884 = vmatpush.msrb.mxu2 %v1821_v25 }
 0x1c0   : > { %1870 = vmatpush.msrb.mxu1 %v1799_v57 }
 0x1c1   : > { %1766 = vmatpush.msra.mxu3 %v1513_v14  ;;  %1885 = vmatpush.msrb.mxu2 %v1820_v5 }
 0x1c3   : > { %1767 = vmatpush.msra.mxu3 %v1510_v15  ;;  %1886 = vmatpush.msrb.mxu2 %v1819_v10 }
 0x1c5   : > { %1768 = vmatpush.msra.mxu3 %v1507_v63  ;;  %1887 = vmatpush.msrb.mxu2 %v1818_v1 }
 0x1c6   : > { %v1557_v3 = vpop.f32.mrf.mxu0 }
 0x1c7   : > { %1769 = vmatpush.msra.mxu3 %v1504_v7  ;;  %v1558_v9 = vadd.f32 %v1557_v3, %v1534_v4 }
 0x1c9   : > { %1770 = vmatpush.msra.mxu3 %v1501_v16  ;;  %v1817_v16 = vld [vmem:[#allocation10 + $0x110] sm:$0xff] }
 0x1ca   : > { %1888 = vmatpush.msrb.mxu2 %v1817_v16 }
 0x1cb   : > { %1771 = vmatpush.msra.mxu3 %v1498_v17  ;;  %v1577_v6 = vpop.f32.mrf.mxu1 }
 0x1cc   : > { %v1578_v11 = vadd.f32 %v1577_v6, %v1558_v9 }
 0x1cd   : > { %1772 = vmatpush.msra.mxu3 %v1495_v18  ;;  %v1816_v18 = vld [vmem:[#allocation10 + $0x108] sm:$0xff] }
 0x1ce   : > { %1889 = vmatpush.msrb.mxu2 %v1816_v18 }
 0x1cf   : > { %1773 = vmatpush.msra.mxu3 %v1492_v0  ;;  %v1815_v0 = vld [vmem:[#allocation10 + $0x100] sm:$0xff] }
 0x1d0   : > { %1890 = vmatpush.msrb.mxu2 %v1815_v0 }
 0x1d1   : > { %1774 = vmatpush.msra.mxu3 %v1489_v19 }
 0x1d3   : > { %1775 = vmatpush.msra.mxu3 %v1486_v20 }
 0x1d4   : > { %1776 = vmatmul.f32.vlgmr.msra.gmra.mxu3 %v1339_v8 }
 0x1d5   : > { %1916 = vmatpush.msrb.mxu3 %v1911_v39 }
 0x1d7   : > { %1917 = vmatpush.msrb.mxu3 %v1910_v28 }
 0x1d9   : > { %1918 = vmatpush.msrb.mxu3 %v1909_v40 }
 0x1db   : > { %1919 = vmatpush.msrb.mxu3 %v1908_v42 }
 0x1dd   : > { %1920 = vmatpush.msrb.mxu3 %v1907_v41 }
 0x1df   : > { %1921 = vmatpush.msrb.mxu3 %v1906_v43 }
 0x1e1   : > { %1922 = vmatpush.msrb.mxu3 %v1905_v32 }
 0x1e3   : > { %1923 = vmatpush.msrb.mxu3 %v1904_v44 }
 0x1e5   : > { %1924 = vmatpush.msrb.mxu3 %v1903_v45 }
 0x1e6   : > { %v1637_v13 = vpop.f32.mrf.mxu0 }
 0x1e7   : > { %v1638_v63 = vadd.f32 %v1637_v13, %v1535_v12  ;;  %v1657_v19 = vpop.f32.mrf.mxu1  ;;  %1925 = vmatpush.msrb.mxu3 %v1902_v46 }
 0x1e9   : > { %v1658_v21 = vadd.f32 %v1657_v19, %v1638_v63  ;;  %1926 = vmatpush.msrb.mxu3 %v1901_v47 }
 0x1eb   : > { %1927 = vmatpush.msrb.mxu3 %v1900_v48 }
 0x1ed   : > { %1928 = vmatpush.msrb.mxu3 %v1899_v49 }
 0x1ef   : > { %1929 = vmatpush.msrb.mxu3 %v1898_v50 }
 0x1f1   : > { %1930 = vmatpush.msrb.mxu3 %v1897_v51 }
 0x1f3   : > { %1931 = vmatpush.msrb.mxu3 %v1896_v52 }
 0x206   : > { %v1717_v30 = vpop.f32.mrf.mxu0 }
 0x207   : > { %v1718_v31 = vadd.f32 %v1717_v30, %v1536_v29  ;;  %v1737_v33 = vpop.f32.mrf.mxu1 }
 0x209   : > { %v1738_v35 = vadd.f32 %v1737_v33, %v1718_v31 }
 0x20e   : > { %v1597_v8 = vpop.f32.mrf.mxu2 }
 0x20f   : > { %v1598_v14 = vadd.f32 %v1597_v8, %v1578_v11 }
 0x216   : > { %v1677_v20 = vpop.f32.mrf.mxu2 }
 0x217   : > { %v1678_v22 = vadd.f32 %v1677_v20, %v1658_v21 }
 0x22e   : > { %v1757_v34 = vpop.f32.mrf.mxu2 }
 0x22f   : > { %v1758_v23 = vadd.f32 %v1757_v34, %v1738_v35 }
 0x237   : > { %v1617_v15 = vpop.f32.mrf.mxu3 }
 0x238   : > { %v1618_v7 = vadd.f32 %v1617_v15, %v1598_v14 }
 0x23a   : > { %v1780_v17 = vmax.f32 %v1618_v7, 0.0 }
 0x23c   : > { %1851 = vmatmul.f32.vlgmr.msrb.gmra.mxu0 %v1780_v17 }
 0x23f   : > { %v1697_v24 = vpop.f32.mrf.mxu3 }
 0x240   : > { %v1698_v26 = vadd.f32 %v1697_v24, %v1678_v22 }
 0x242   : > { %v1781_v27 = vmax.f32 %v1698_v26, 0.0 }
 0x244   : > { %1871 = vmatmul.f32.vlgmr.msrb.gmra.mxu1 %v1781_v27 }
 0x257   : > { %v1777_v36 = vpop.f32.mrf.mxu3 }
 0x258   : > { %v1778_v37 = vadd.f32 %v1777_v36, %v1758_v23 }
 0x25a   : > { %v1782_v38 = vmax.f32 %v1778_v37, 0.0 }
 0x25c   : > { %1891 = vmatmul.f32.vlgmr.msrb.gmra.mxu2 %v1782_v38 }
 0x2b9   : > { %v1852_v54 = vpop.f32.mrf.mxu0 }
 0x2ba   : > { %v1853_v56 = vadd.f32 %v2264_v53, %v1852_v54 }
 0x2c1   : > { %v1872_v55 = vpop.f32.mrf.mxu1 }
 0x2c2   : > { %v1873_v57 = vadd.f32 %v1872_v55, %v1853_v56 }
 0x2df   : > { %v1892_v58 = vpop.f32.mrf.mxu2 }
 0x2e0   : > { %v1893_v59 = vadd.f32 %v1892_v58, %v1873_v57 }
 0x2e2   : > { %v1895_v60 = vmax.f32 %v1893_v59, 0.0 }
 0x2e4   : > { %1932 = vmatmul.f32.vlgmr.msrb.gmra.mxu3 %v1895_v60 }
 0x367   : > { %v1933_v62 = vpop.f32.mrf.mxu3 }
 0x368   : > { %v1934_v2 = vadd.f32 %v2265_v61, %v1933_v62 }
 0x36a   : > { %v2132_v3 = vmul.f32 -1.442695, %v1934_v2 }
 0x36c   : > { %2266 = vpow2.f32 %v2132_v3 }
 0x372   : > { %v2267_v4 = vpop.eup %2266 }
 0x373   : > { %v1939_v25 = vadd.f32 1.0, %v2267_v4 }
 0x375   : > { %2268 = vrcp.f32 %v1939_v25  ;;  %v1951_v9 = vand.u32 2147483648, %v1939_v25  ;;  %v1949_v11 = vand.u32 2147483647, %v1939_v25  ;;  %vm1945_vm1 = vweird.f32 %v1939_v25 }
 0x377   : > { %v1952_v1 = vor.u32 1.1754944e-38, %v1951_v9  ;;  %vm1950_vm3 = vcmp.eq.f32.partialorder %v1949_v11, 8.507059e+37 }
 0x37b   : > { %v2269_v5 = vpop.eup %2268 }
 0x37c   : > { %v1941_v6 = vmul.f32 %v2269_v5, %v1939_v25  ;;  %vm1946_vm0 = vweird.f32 %v2269_v5 }
 0x37d   : > { %vm1947_vm2 = vmor %vm1945_vm1, %vm1946_vm0 }
 0x37e   : > { %v1942_v8 = vsub.f32 1.0, %v1941_v6 }
 0x380   : > { %v1943_v10 = vmul.f32 %v2269_v5, %v1942_v8 }
 0x382   : > { %v1944_v12 = vadd.f32 %v2269_v5, %v1943_v10 }
 0x384   : > { %v1948_v13 = vsel %vm1947_vm2, %v2269_v5, %v1944_v12 }
 0x385   : > { %v1953_v14 = vsel %vm1950_vm3, %v1952_v1, %v1948_v13 }
 0x386   : > { %1955 = vst [vmem:[%s450_s29] sm:$0xff] %v1953_v14 }
 0x387   : > { %2541 = shalt.err (!%p2538_p8)
}
 0x388   : > { %2170 = dma.vmem_to_hbm [thread:$0]  (%p2700_p5), %s1970_s27, 128, %s1972_s1, %s1957_s13  }
 0x389 PF: > { %p2217_p9 = scmp.ge.s32.totalorder %s2596_s12, 2  ;;  %s1983_s14 = sand.u32 1, %s2584_s30  }
 0x38a   : > { %s1984_s18 = scalar_lea.sflag [#allocation4], %s1983_s14 }
 0x38b   : > { %p2198_p10 = pnand %p2217_p9, %p2704_p6 }
 0x38d   : > { %p2199_p11 = pneg %p2198_p10 }
 0x38f   : > { %2579 = dma.done.wait (%p2199_p11), %s1984_s18, 128  }
 0x390   : > { %2581 = vsyncadd (%p2199_p11), %s1984_s18, 4294967168  ;;  %s2912_s16 = sld [smem:[#allocation23_spill]]  ;;  %p24_p12 = scmp.ge.s32.totalorder %s2687_s15, 4  }
 0x391   : > { %s2913_s30 = smov %s2588_s10  ;;  %s2914_s10 = smov %s2592_s11 }
 0x392   : > { %s2916_s12 = smov %s2687_s15  ;;  %26 = sbr.rel (!%p24_p12) target bundleno = 14 (0xe), region = 124 }
 0x396   : > { %s2915_s11 = smov %s2912_s16 }
 0x397   :  { %1990 = vsyncpa [#allocation3], 1 }
 0x398   :  { %1992 = vsyncpa [#allocation3 + $0x1], 1 }
 0x399   :  { %1993 = vsyncpa [#allocation6], 1 }
 0x39a   :  { %1994 = vsyncpa [#allocation9], 1 }
 0x39b   :  { %1995 = vsyncpa [#allocation12], 1 }
 0x39c   :  { %1996 = vsyncpa [#allocation15], 1 }
 0x39d   :  { %1997 = vsyncpa [#allocation4], 1 }
 0x39e   :  { %1999 = vsyncpa [#allocation4 + $0x1], 1 }

</bundles_post_ra>
